<compile_context>
chip_gen: v6e
topology: v6e:2x2x1
jax: 0.10.0
libtpu: 0.0.40
codegen_flags: <defaults>
</compile_context>

<pallas_src>
import jax
import jax.numpy as jnp
from jax.experimental import pallas as pl
from jax.experimental.pallas import tpu as pltpu


def glove_kernel(idx_ref, wi_t_ref, wj_t_ref, o_ref):
    # idx_ref:  (1, 2, ROWS, TB) int32  fused i/j index chunk (lane-major)
    # wi_t_ref: (D_pad, V_pad)   f32    transposed augmented i-table (resident)
    # wj_t_ref: (D_pad, V_pad)   f32    transposed augmented j-table (resident)
    # o_ref:    (1, ROWS, TB)    f32    output block
    v_pad = wi_t_ref.shape[1]
    rows = o_ref.shape[1]
    tb = o_ref.shape[2]

    # Hoist the resident-table loads and the iota out of the row loop.
    wi_t = wi_t_ref[...]
    wj_t = wj_t_ref[...]
    iota_v = jax.lax.broadcasted_iota(jnp.int32, (v_pad, tb), 0)

    # Natural (M,K)@(K,N) MXU orientation: (D_pad, V) @ (V, TB) -> (D_pad, TB)
    dims = (((1,), (0,)), ((), ()))

    for r in range(rows):  # static, fully unrolled sublane-row loop
        idx_i = idx_ref[0, 0, r : r + 1, :]  # (1, TB)
        idx_j = idx_ref[0, 1, r : r + 1, :]  # (1, TB)

        # One-hot gather matrices, (V_pad, TB): onehot[v, b] = (idx[b] == v).
        onehot_i = (iota_v == idx_i).astype(jnp.float32)
        onehot_j = (iota_v == idx_j).astype(jnp.float32)

        # Row gather on the MXU -> (D_pad, TB) per-sample embedding columns.
        w_i = jax.lax.dot_general(wi_t, onehot_i, dims,
                                  preferred_element_type=jnp.float32)
        w_j = jax.lax.dot_general(wj_t, onehot_j, dims,
                                  preferred_element_type=jnp.float32)

        # Per-sample dot product (bias already folded into the extra columns):
        # sublane reduce over D_pad -> lane-dense (1, TB) row of the output.
        o_ref[0, r : r + 1, :] = jnp.sum(w_i * w_j, axis=0, keepdims=True)


def anime_glove_forward(wi, wj, bi, bj, i_indices, j_indices, *, tb=256, rows=8):
    """Pallas implementation of AnimeGlove.forward.

    wi, wj: (V, D) float32 embedding tables
    bi, bj: (V, 1) float32 bias tables
    i_indices, j_indices: (B,) integer indices
    returns: (B,) float32
    """
    B = i_indices.shape[0]
    V, D = wi.shape

    # Fold biases into the tables:
    #   sum_d wi_aug[i,d]*wj_aug[j,d] = sum_d wi*wj + bi[i]*1 + 1*bj[j]
    ones = jnp.ones((V, 1), dtype=jnp.float32)
    wi_aug = jnp.concatenate(
        [wi.astype(jnp.float32), bi.reshape(V, 1).astype(jnp.float32), ones], axis=1)
    wj_aug = jnp.concatenate(
        [wj.astype(jnp.float32), ones, bj.reshape(V, 1).astype(jnp.float32)], axis=1)

    # Zero-pad D_aug up to a multiple of 8 and V up to a multiple of 8
    # (zero columns/rows contribute nothing / are never selected).
    d_aug = D + 2
    d_pad = ((d_aug + 7) // 8) * 8
    v_pad = ((V + 7) // 8) * 8
    wi_aug = jnp.pad(wi_aug, ((0, v_pad - V), (0, d_pad - d_aug)))
    wj_aug = jnp.pad(wj_aug, ((0, v_pad - V), (0, d_pad - d_aug)))

    # Pre-transpose ONCE in the wrapper: kernel sees (D_pad, V_pad) so the
    # stationary MXU operand never needs an in-kernel relayout.
    wi_t = jnp.transpose(wi_aug)  # (d_pad, v_pad)
    wj_t = jnp.transpose(wj_aug)  # (d_pad, v_pad)

    # Pad the batch to a multiple of rows*tb (pad indices with 0 - a valid
    # row - and slice the padded outputs away afterwards), and fuse the two
    # index streams into a single array -> one index DMA per grid step.
    samples_per_block = rows * tb
    num_blocks = pl.cdiv(B, samples_per_block)
    b_pad = num_blocks * samples_per_block
    pad = b_pad - B
    ii = jnp.pad(i_indices.astype(jnp.int32), (0, pad)).reshape(num_blocks, rows, tb)
    jj = jnp.pad(j_indices.astype(jnp.int32), (0, pad)).reshape(num_blocks, rows, tb)
    idx = jnp.stack([ii, jj], axis=1)  # (num_blocks, 2, rows, tb)

    out = pl.pallas_call(
        glove_kernel,
        out_shape=jax.ShapeDtypeStruct((num_blocks, rows, tb), jnp.float32),
        grid=(num_blocks,),
        in_specs=[
            pl.BlockSpec((1, 2, rows, tb), lambda g: (g, 0, 0, 0)),  # fused idx
            pl.BlockSpec((d_pad, v_pad), lambda g: (0, 0)),          # wi_aug^T
            pl.BlockSpec((d_pad, v_pad), lambda g: (0, 0)),          # wj_aug^T
        ],
        out_specs=pl.BlockSpec((1, rows, tb), lambda g: (g, 0, 0)),
        compiler_params=pltpu.CompilerParams(
            dimension_semantics=("parallel",),
            vmem_limit_bytes=32 * 1024 * 1024,
        ),
    )(idx, wi_t, wj_t)

    return out.reshape(b_pad)[:B]


if __name__ == "__main__":
    # Small, deterministic setup consistent with the module's __init__.
    num_embeddings = 64     # vocabulary size
    embedding_dim = 32      # embedding dimension
    batch = 16              # number of (i, j) index pairs

    key = jax.random.PRNGKey(0)
    k_wi, k_wj, k_i, k_j = jax.random.split(key, 4)

    # Parameter init mirrors the PyTorch module:
    #   wi.weight, wj.weight ~ U(-1, 1); bi.weight, bj.weight = 0
    wi = jax.random.uniform(k_wi, (num_embeddings, embedding_dim),
                            dtype=jnp.float32, minval=-1.0, maxval=1.0)
    wj = jax.random.uniform(k_wj, (num_embeddings, embedding_dim),
                            dtype=jnp.float32, minval=-1.0, maxval=1.0)
    bi = jnp.zeros((num_embeddings, 1), dtype=jnp.float32)
    bj = jnp.zeros((num_embeddings, 1), dtype=jnp.float32)

    i_indices = jax.random.randint(k_i, (batch,), 0, num_embeddings, dtype=jnp.int32)
    j_indices = jax.random.randint(k_j, (batch,), 0, num_embeddings, dtype=jnp.int32)

    out = anime_glove_forward(wi, wj, bi, bj, i_indices, j_indices)
    out = jax.block_until_ready(out)

    # Pure-JAX reference for correctness.
    ref = (jnp.sum(wi[i_indices] * wj[j_indices], axis=1)
           + bi[i_indices, 0] + bj[j_indices, 0])
    assert out.shape == (batch,)
    assert jnp.allclose(out, ref, atol=1e-5, rtol=1e-5), (out, ref)

    print("KERNEL_OK")
</pallas_src>

<mosaic_0001>
module attributes {stable_mosaic.version = 11 : i64} {
  func.func @glove_kernel(%arg0: i32, %arg1: memref<1x2x8x256xi32, #tpu.memory_space<vmem>>, %arg2: memref<40x64xf32, #tpu.memory_space<vmem>>, %arg3: memref<40x64xf32, #tpu.memory_space<vmem>>, %arg4: memref<1x8x256xf32, #tpu.memory_space<vmem>>) attributes {dimension_semantics = [#tpu.dimension_semantics<parallel>], iteration_bounds = array<i64: 1>, scalar_prefetch = 0 : i64, scratch_operands = 0 : i64, tpu.core_type = #tpu.core_type<tc>, window_params = [{transform_indices = @transform_0, window_bounds = array<i64: 1, 2, 8, 256>}, {pipeline_mode = #tpu.pipeline_mode<synchronous>, transform_indices = @transform_1, window_bounds = array<i64: 40, 64>}, {pipeline_mode = #tpu.pipeline_mode<synchronous>, transform_indices = @transform_2, window_bounds = array<i64: 40, 64>}, {transform_indices = @transform_3, window_bounds = array<i64: 1, 8, 256>}]} {
    %c0 = arith.constant 0 : index
    %c0_0 = arith.constant 0 : index
    %0 = vector.load %arg2[%c0, %c0_0] : memref<40x64xf32, #tpu.memory_space<vmem>>, vector<40x64xf32>
    %c0_1 = arith.constant 0 : index
    %c0_2 = arith.constant 0 : index
    %1 = vector.load %arg3[%c0_1, %c0_2] : memref<40x64xf32, #tpu.memory_space<vmem>>, vector<40x64xf32>
    %2 = tpu.iota {dimensions = array<i32: 0>} : vector<64x256xi32>
    %c0_3 = arith.constant 0 : index
    %c0_4 = arith.constant 0 : index
    %c0_5 = arith.constant 0 : index
    %c0_6 = arith.constant 0 : index
    %3 = vector.load %arg1[%c0_3, %c0_4, %c0_5, %c0_6] : memref<1x2x8x256xi32, #tpu.memory_space<vmem>>, vector<1x1x1x256xi32>
    %4 = vector.shape_cast %3 : vector<1x1x1x256xi32> to vector<1x256xi32>
    %c0_7 = arith.constant 0 : index
    %c1 = arith.constant 1 : index
    %c0_8 = arith.constant 0 : index
    %c0_9 = arith.constant 0 : index
    %5 = vector.load %arg1[%c0_7, %c1, %c0_8, %c0_9] : memref<1x2x8x256xi32, #tpu.memory_space<vmem>>, vector<1x1x1x256xi32>
    %6 = vector.shape_cast %5 : vector<1x1x1x256xi32> to vector<1x256xi32>
    %7 = vector.broadcast %4 : vector<1x256xi32> to vector<64x256xi32>
    %8 = arith.cmpi eq, %2, %7 : vector<64x256xi32>
    %9 = arith.extui %8 : vector<64x256xi1> to vector<64x256xi32>
    %10 = arith.sitofp %9 : vector<64x256xi32> to vector<64x256xf32>
    %11 = vector.broadcast %6 : vector<1x256xi32> to vector<64x256xi32>
    %12 = arith.cmpi eq, %2, %11 : vector<64x256xi32>
    %13 = arith.extui %12 : vector<64x256xi1> to vector<64x256xi32>
    %14 = arith.sitofp %13 : vector<64x256xi32> to vector<64x256xf32>
    %cst = arith.constant dense<0.000000e+00> : vector<40x256xf32>
    %15 = tpu.matmul %0, %10, %cst {dimension_numbers = #tpu.dot_dimension_numbers<[1], [0], [0], [1], [0, 0, 1, 1], [], []>} : vector<40x64xf32>, vector<64x256xf32>, vector<40x256xf32> -> vector<40x256xf32>
    %cst_10 = arith.constant dense<0.000000e+00> : vector<40x256xf32>
    %16 = tpu.matmul %1, %14, %cst_10 {dimension_numbers = #tpu.dot_dimension_numbers<[1], [0], [0], [1], [0, 0, 1, 1], [], []>} : vector<40x64xf32>, vector<64x256xf32>, vector<40x256xf32> -> vector<40x256xf32>
    %17 = arith.mulf %15, %16 : vector<40x256xf32>
    %cst_11 = arith.constant dense<0.000000e+00> : vector<256xf32>
    %18 = vector.multi_reduction <add>, %17, %cst_11 [0] : vector<40x256xf32> to vector<256xf32>
    %19 = vector.shape_cast %18 : vector<256xf32> to vector<1x256xf32>
    %c0_12 = arith.constant 0 : index
    %c0_13 = arith.constant 0 : index
    %c0_14 = arith.constant 0 : index
    %20 = vector.load %arg4[%c0_12, %c0_13, %c0_14] : memref<1x8x256xf32, #tpu.memory_space<vmem>>, vector<1x1x256xf32>
    %21 = vector.shape_cast %20 : vector<1x1x256xf32> to vector<1x256xf32>
    %22 = vector.shape_cast %19 : vector<1x256xf32> to vector<1x1x256xf32>
    tpu.vector_store %arg4[%c0_12, %c0_13, %c0_14], %22 {strides = array<i32>} : memref<1x8x256xf32, #tpu.memory_space<vmem>>, vector<1x1x256xf32>,
    %c0_15 = arith.constant 0 : index
    %c0_16 = arith.constant 0 : index
    %c1_17 = arith.constant 1 : index
    %c0_18 = arith.constant 0 : index
    %23 = vector.load %arg1[%c0_15, %c0_16, %c1_17, %c0_18] : memref<1x2x8x256xi32, #tpu.memory_space<vmem>>, vector<1x1x1x256xi32>
    %24 = vector.shape_cast %23 : vector<1x1x1x256xi32> to vector<1x256xi32>
    %c0_19 = arith.constant 0 : index
    %c1_20 = arith.constant 1 : index
    %c1_21 = arith.constant 1 : index
    %c0_22 = arith.constant 0 : index
    %25 = vector.load %arg1[%c0_19, %c1_20, %c1_21, %c0_22] : memref<1x2x8x256xi32, #tpu.memory_space<vmem>>, vector<1x1x1x256xi32>
    %26 = vector.shape_cast %25 : vector<1x1x1x256xi32> to vector<1x256xi32>
    %27 = vector.broadcast %24 : vector<1x256xi32> to vector<64x256xi32>
    %28 = arith.cmpi eq, %2, %27 : vector<64x256xi32>
    %29 = arith.extui %28 : vector<64x256xi1> to vector<64x256xi32>
    %30 = arith.sitofp %29 : vector<64x256xi32> to vector<64x256xf32>
    %31 = vector.broadcast %26 : vector<1x256xi32> to vector<64x256xi32>
    %32 = arith.cmpi eq, %2, %31 : vector<64x256xi32>
    %33 = arith.extui %32 : vector<64x256xi1> to vector<64x256xi32>
    %34 = arith.sitofp %33 : vector<64x256xi32> to vector<64x256xf32>
    %cst_23 = arith.constant dense<0.000000e+00> : vector<40x256xf32>
    %35 = tpu.matmul %0, %30, %cst_23 {dimension_numbers = #tpu.dot_dimension_numbers<[1], [0], [0], [1], [0, 0, 1, 1], [], []>} : vector<40x64xf32>, vector<64x256xf32>, vector<40x256xf32> -> vector<40x256xf32>
    %cst_24 = arith.constant dense<0.000000e+00> : vector<40x256xf32>
    %36 = tpu.matmul %1, %34, %cst_24 {dimension_numbers = #tpu.dot_dimension_numbers<[1], [0], [0], [1], [0, 0, 1, 1], [], []>} : vector<40x64xf32>, vector<64x256xf32>, vector<40x256xf32> -> vector<40x256xf32>
    %37 = arith.mulf %35, %36 : vector<40x256xf32>
    %cst_25 = arith.constant dense<0.000000e+00> : vector<256xf32>
    %38 = vector.multi_reduction <add>, %37, %cst_25 [0] : vector<40x256xf32> to vector<256xf32>
    %39 = vector.shape_cast %38 : vector<256xf32> to vector<1x256xf32>
    %c0_26 = arith.constant 0 : index
    %c1_27 = arith.constant 1 : index
    %c0_28 = arith.constant 0 : index
    %40 = vector.load %arg4[%c0_26, %c1_27, %c0_28] : memref<1x8x256xf32, #tpu.memory_space<vmem>>, vector<1x1x256xf32>
    %41 = vector.shape_cast %40 : vector<1x1x256xf32> to vector<1x256xf32>
    %42 = vector.shape_cast %39 : vector<1x256xf32> to vector<1x1x256xf32>
    tpu.vector_store %arg4[%c0_26, %c1_27, %c0_28], %42 {strides = array<i32>} : memref<1x8x256xf32, #tpu.memory_space<vmem>>, vector<1x1x256xf32>,
    %c0_29 = arith.constant 0 : index
    %c0_30 = arith.constant 0 : index
    %c2 = arith.constant 2 : index
    %c0_31 = arith.constant 0 : index
    %43 = vector.load %arg1[%c0_29, %c0_30, %c2, %c0_31] : memref<1x2x8x256xi32, #tpu.memory_space<vmem>>, vector<1x1x1x256xi32>
    %44 = vector.shape_cast %43 : vector<1x1x1x256xi32> to vector<1x256xi32>
    %c0_32 = arith.constant 0 : index
    %c1_33 = arith.constant 1 : index
    %c2_34 = arith.constant 2 : index
    %c0_35 = arith.constant 0 : index
    %45 = vector.load %arg1[%c0_32, %c1_33, %c2_34, %c0_35] : memref<1x2x8x256xi32, #tpu.memory_space<vmem>>, vector<1x1x1x256xi32>
    %46 = vector.shape_cast %45 : vector<1x1x1x256xi32> to vector<1x256xi32>
    %47 = vector.broadcast %44 : vector<1x256xi32> to vector<64x256xi32>
    %48 = arith.cmpi eq, %2, %47 : vector<64x256xi32>
    %49 = arith.extui %48 : vector<64x256xi1> to vector<64x256xi32>
    %50 = arith.sitofp %49 : vector<64x256xi32> to vector<64x256xf32>
    %51 = vector.broadcast %46 : vector<1x256xi32> to vector<64x256xi32>
    %52 = arith.cmpi eq, %2, %51 : vector<64x256xi32>
    %53 = arith.extui %52 : vector<64x256xi1> to vector<64x256xi32>
    %54 = arith.sitofp %53 : vector<64x256xi32> to vector<64x256xf32>
    %cst_36 = arith.constant dense<0.000000e+00> : vector<40x256xf32>
    %55 = tpu.matmul %0, %50, %cst_36 {dimension_numbers = #tpu.dot_dimension_numbers<[1], [0], [0], [1], [0, 0, 1, 1], [], []>} : vector<40x64xf32>, vector<64x256xf32>, vector<40x256xf32> -> vector<40x256xf32>
    %cst_37 = arith.constant dense<0.000000e+00> : vector<40x256xf32>
    %56 = tpu.matmul %1, %54, %cst_37 {dimension_numbers = #tpu.dot_dimension_numbers<[1], [0], [0], [1], [0, 0, 1, 1], [], []>} : vector<40x64xf32>, vector<64x256xf32>, vector<40x256xf32> -> vector<40x256xf32>
    %57 = arith.mulf %55, %56 : vector<40x256xf32>
    %cst_38 = arith.constant dense<0.000000e+00> : vector<256xf32>
    %58 = vector.multi_reduction <add>, %57, %cst_38 [0] : vector<40x256xf32> to vector<256xf32>
    %59 = vector.shape_cast %58 : vector<256xf32> to vector<1x256xf32>
    %c0_39 = arith.constant 0 : index
    %c2_40 = arith.constant 2 : index
    %c0_41 = arith.constant 0 : index
    %60 = vector.load %arg4[%c0_39, %c2_40, %c0_41] : memref<1x8x256xf32, #tpu.memory_space<vmem>>, vector<1x1x256xf32>
    %61 = vector.shape_cast %60 : vector<1x1x256xf32> to vector<1x256xf32>
    %62 = vector.shape_cast %59 : vector<1x256xf32> to vector<1x1x256xf32>
    tpu.vector_store %arg4[%c0_39, %c2_40, %c0_41], %62 {strides = array<i32>} : memref<1x8x256xf32, #tpu.memory_space<vmem>>, vector<1x1x256xf32>,
    %c0_42 = arith.constant 0 : index
    %c0_43 = arith.constant 0 : index
    %c3 = arith.constant 3 : index
    %c0_44 = arith.constant 0 : index
    %63 = vector.load %arg1[%c0_42, %c0_43, %c3, %c0_44] : memref<1x2x8x256xi32, #tpu.memory_space<vmem>>, vector<1x1x1x256xi32>
    %64 = vector.shape_cast %63 : vector<1x1x1x256xi32> to vector<1x256xi32>
    %c0_45 = arith.constant 0 : index
    %c1_46 = arith.constant 1 : index
    %c3_47 = arith.constant 3 : index
    %c0_48 = arith.constant 0 : index
    %65 = vector.load %arg1[%c0_45, %c1_46, %c3_47, %c0_48] : memref<1x2x8x256xi32, #tpu.memory_space<vmem>>, vector<1x1x1x256xi32>
    %66 = vector.shape_cast %65 : vector<1x1x1x256xi32> to vector<1x256xi32>
    %67 = vector.broadcast %64 : vector<1x256xi32> to vector<64x256xi32>
    %68 = arith.cmpi eq, %2, %67 : vector<64x256xi32>
    %69 = arith.extui %68 : vector<64x256xi1> to vector<64x256xi32>
    %70 = arith.sitofp %69 : vector<64x256xi32> to vector<64x256xf32>
    %71 = vector.broadcast %66 : vector<1x256xi32> to vector<64x256xi32>
    %72 = arith.cmpi eq, %2, %71 : vector<64x256xi32>
    %73 = arith.extui %72 : vector<64x256xi1> to vector<64x256xi32>
    %74 = arith.sitofp %73 : vector<64x256xi32> to vector<64x256xf32>
    %cst_49 = arith.constant dense<0.000000e+00> : vector<40x256xf32>
    %75 = tpu.matmul %0, %70, %cst_49 {dimension_numbers = #tpu.dot_dimension_numbers<[1], [0], [0], [1], [0, 0, 1, 1], [], []>} : vector<40x64xf32>, vector<64x256xf32>, vector<40x256xf32> -> vector<40x256xf32>
    %cst_50 = arith.constant dense<0.000000e+00> : vector<40x256xf32>
    %76 = tpu.matmul %1, %74, %cst_50 {dimension_numbers = #tpu.dot_dimension_numbers<[1], [0], [0], [1], [0, 0, 1, 1], [], []>} : vector<40x64xf32>, vector<64x256xf32>, vector<40x256xf32> -> vector<40x256xf32>
    %77 = arith.mulf %75, %76 : vector<40x256xf32>
    %cst_51 = arith.constant dense<0.000000e+00> : vector<256xf32>
    %78 = vector.multi_reduction <add>, %77, %cst_51 [0] : vector<40x256xf32> to vector<256xf32>
    %79 = vector.shape_cast %78 : vector<256xf32> to vector<1x256xf32>
    %c0_52 = arith.constant 0 : index
    %c3_53 = arith.constant 3 : index
    %c0_54 = arith.constant 0 : index
    %80 = vector.load %arg4[%c0_52, %c3_53, %c0_54] : memref<1x8x256xf32, #tpu.memory_space<vmem>>, vector<1x1x256xf32>
    %81 = vector.shape_cast %80 : vector<1x1x256xf32> to vector<1x256xf32>
    %82 = vector.shape_cast %79 : vector<1x256xf32> to vector<1x1x256xf32>
    tpu.vector_store %arg4[%c0_52, %c3_53, %c0_54], %82 {strides = array<i32>} : memref<1x8x256xf32, #tpu.memory_space<vmem>>, vector<1x1x256xf32>,
    %c0_55 = arith.constant 0 : index
    %c0_56 = arith.constant 0 : index
    %c4 = arith.constant 4 : index
    %c0_57 = arith.constant 0 : index
    %83 = vector.load %arg1[%c0_55, %c0_56, %c4, %c0_57] : memref<1x2x8x256xi32, #tpu.memory_space<vmem>>, vector<1x1x1x256xi32>
    %84 = vector.shape_cast %83 : vector<1x1x1x256xi32> to vector<1x256xi32>
    %c0_58 = arith.constant 0 : index
    %c1_59 = arith.constant 1 : index
    %c4_60 = arith.constant 4 : index
    %c0_61 = arith.constant 0 : index
    %85 = vector.load %arg1[%c0_58, %c1_59, %c4_60, %c0_61] : memref<1x2x8x256xi32, #tpu.memory_space<vmem>>, vector<1x1x1x256xi32>
    %86 = vector.shape_cast %85 : vector<1x1x1x256xi32> to vector<1x256xi32>
    %87 = vector.broadcast %84 : vector<1x256xi32> to vector<64x256xi32>
    %88 = arith.cmpi eq, %2, %87 : vector<64x256xi32>
    %89 = arith.extui %88 : vector<64x256xi1> to vector<64x256xi32>
    %90 = arith.sitofp %89 : vector<64x256xi32> to vector<64x256xf32>
    %91 = vector.broadcast %86 : vector<1x256xi32> to vector<64x256xi32>
    %92 = arith.cmpi eq, %2, %91 : vector<64x256xi32>
    %93 = arith.extui %92 : vector<64x256xi1> to vector<64x256xi32>
    %94 = arith.sitofp %93 : vector<64x256xi32> to vector<64x256xf32>
    %cst_62 = arith.constant dense<0.000000e+00> : vector<40x256xf32>
    %95 = tpu.matmul %0, %90, %cst_62 {dimension_numbers = #tpu.dot_dimension_numbers<[1], [0], [0], [1], [0, 0, 1, 1], [], []>} : vector<40x64xf32>, vector<64x256xf32>, vector<40x256xf32> -> vector<40x256xf32>
    %cst_63 = arith.constant dense<0.000000e+00> : vector<40x256xf32>
    %96 = tpu.matmul %1, %94, %cst_63 {dimension_numbers = #tpu.dot_dimension_numbers<[1], [0], [0], [1], [0, 0, 1, 1], [], []>} : vector<40x64xf32>, vector<64x256xf32>, vector<40x256xf32> -> vector<40x256xf32>
    %97 = arith.mulf %95, %96 : vector<40x256xf32>
    %cst_64 = arith.constant dense<0.000000e+00> : vector<256xf32>
    %98 = vector.multi_reduction <add>, %97, %cst_64 [0] : vector<40x256xf32> to vector<256xf32>
    %99 = vector.shape_cast %98 : vector<256xf32> to vector<1x256xf32>
    %c0_65 = arith.constant 0 : index
    %c4_66 = arith.constant 4 : index
    %c0_67 = arith.constant 0 : index
    %100 = vector.load %arg4[%c0_65, %c4_66, %c0_67] : memref<1x8x256xf32, #tpu.memory_space<vmem>>, vector<1x1x256xf32>
    %101 = vector.shape_cast %100 : vector<1x1x256xf32> to vector<1x256xf32>
    %102 = vector.shape_cast %99 : vector<1x256xf32> to vector<1x1x256xf32>
    tpu.vector_store %arg4[%c0_65, %c4_66, %c0_67], %102 {strides = array<i32>} : memref<1x8x256xf32, #tpu.memory_space<vmem>>, vector<1x1x256xf32>,
    %c0_68 = arith.constant 0 : index
    %c0_69 = arith.constant 0 : index
    %c5 = arith.constant 5 : index
    %c0_70 = arith.constant 0 : index
    %103 = vector.load %arg1[%c0_68, %c0_69, %c5, %c0_70] : memref<1x2x8x256xi32, #tpu.memory_space<vmem>>, vector<1x1x1x256xi32>
    %104 = vector.shape_cast %103 : vector<1x1x1x256xi32> to vector<1x256xi32>
    %c0_71 = arith.constant 0 : index
    %c1_72 = arith.constant 1 : index
    %c5_73 = arith.constant 5 : index
    %c0_74 = arith.constant 0 : index
    %105 = vector.load %arg1[%c0_71, %c1_72, %c5_73, %c0_74] : memref<1x2x8x256xi32, #tpu.memory_space<vmem>>, vector<1x1x1x256xi32>
    %106 = vector.shape_cast %105 : vector<1x1x1x256xi32> to vector<1x256xi32>
    %107 = vector.broadcast %104 : vector<1x256xi32> to vector<64x256xi32>
    %108 = arith.cmpi eq, %2, %107 : vector<64x256xi32>
    %109 = arith.extui %108 : vector<64x256xi1> to vector<64x256xi32>
    %110 = arith.sitofp %109 : vector<64x256xi32> to vector<64x256xf32>
    %111 = vector.broadcast %106 : vector<1x256xi32> to vector<64x256xi32>
    %112 = arith.cmpi eq, %2, %111 : vector<64x256xi32>
    %113 = arith.extui %112 : vector<64x256xi1> to vector<64x256xi32>
    %114 = arith.sitofp %113 : vector<64x256xi32> to vector<64x256xf32>
    %cst_75 = arith.constant dense<0.000000e+00> : vector<40x256xf32>
    %115 = tpu.matmul %0, %110, %cst_75 {dimension_numbers = #tpu.dot_dimension_numbers<[1], [0], [0], [1], [0, 0, 1, 1], [], []>} : vector<40x64xf32>, vector<64x256xf32>, vector<40x256xf32> -> vector<40x256xf32>
    %cst_76 = arith.constant dense<0.000000e+00> : vector<40x256xf32>
    %116 = tpu.matmul %1, %114, %cst_76 {dimension_numbers = #tpu.dot_dimension_numbers<[1], [0], [0], [1], [0, 0, 1, 1], [], []>} : vector<40x64xf32>, vector<64x256xf32>, vector<40x256xf32> -> vector<40x256xf32>
    %117 = arith.mulf %115, %116 : vector<40x256xf32>
    %cst_77 = arith.constant dense<0.000000e+00> : vector<256xf32>
    %118 = vector.multi_reduction <add>, %117, %cst_77 [0] : vector<40x256xf32> to vector<256xf32>
    %119 = vector.shape_cast %118 : vector<256xf32> to vector<1x256xf32>
    %c0_78 = arith.constant 0 : index
    %c5_79 = arith.constant 5 : index
    %c0_80 = arith.constant 0 : index
    %120 = vector.load %arg4[%c0_78, %c5_79, %c0_80] : memref<1x8x256xf32, #tpu.memory_space<vmem>>, vector<1x1x256xf32>
    %121 = vector.shape_cast %120 : vector<1x1x256xf32> to vector<1x256xf32>
    %122 = vector.shape_cast %119 : vector<1x256xf32> to vector<1x1x256xf32>
    tpu.vector_store %arg4[%c0_78, %c5_79, %c0_80], %122 {strides = array<i32>} : memref<1x8x256xf32, #tpu.memory_space<vmem>>, vector<1x1x256xf32>,
    %c0_81 = arith.constant 0 : index
    %c0_82 = arith.constant 0 : index
    %c6 = arith.constant 6 : index
    %c0_83 = arith.constant 0 : index
    %123 = vector.load %arg1[%c0_81, %c0_82, %c6, %c0_83] : memref<1x2x8x256xi32, #tpu.memory_space<vmem>>, vector<1x1x1x256xi32>
    %124 = vector.shape_cast %123 : vector<1x1x1x256xi32> to vector<1x256xi32>
    %c0_84 = arith.constant 0 : index
    %c1_85 = arith.constant 1 : index
    %c6_86 = arith.constant 6 : index
    %c0_87 = arith.constant 0 : index
    %125 = vector.load %arg1[%c0_84, %c1_85, %c6_86, %c0_87] : memref<1x2x8x256xi32, #tpu.memory_space<vmem>>, vector<1x1x1x256xi32>
    %126 = vector.shape_cast %125 : vector<1x1x1x256xi32> to vector<1x256xi32>
    %127 = vector.broadcast %124 : vector<1x256xi32> to vector<64x256xi32>
    %128 = arith.cmpi eq, %2, %127 : vector<64x256xi32>
    %129 = arith.extui %128 : vector<64x256xi1> to vector<64x256xi32>
    %130 = arith.sitofp %129 : vector<64x256xi32> to vector<64x256xf32>
    %131 = vector.broadcast %126 : vector<1x256xi32> to vector<64x256xi32>
    %132 = arith.cmpi eq, %2, %131 : vector<64x256xi32>
    %133 = arith.extui %132 : vector<64x256xi1> to vector<64x256xi32>
    %134 = arith.sitofp %133 : vector<64x256xi32> to vector<64x256xf32>
    %cst_88 = arith.constant dense<0.000000e+00> : vector<40x256xf32>
    %135 = tpu.matmul %0, %130, %cst_88 {dimension_numbers = #tpu.dot_dimension_numbers<[1], [0], [0], [1], [0, 0, 1, 1], [], []>} : vector<40x64xf32>, vector<64x256xf32>, vector<40x256xf32> -> vector<40x256xf32>
    %cst_89 = arith.constant dense<0.000000e+00> : vector<40x256xf32>
    %136 = tpu.matmul %1, %134, %cst_89 {dimension_numbers = #tpu.dot_dimension_numbers<[1], [0], [0], [1], [0, 0, 1, 1], [], []>} : vector<40x64xf32>, vector<64x256xf32>, vector<40x256xf32> -> vector<40x256xf32>
    %137 = arith.mulf %135, %136 : vector<40x256xf32>
    %cst_90 = arith.constant dense<0.000000e+00> : vector<256xf32>
    %138 = vector.multi_reduction <add>, %137, %cst_90 [0] : vector<40x256xf32> to vector<256xf32>
    %139 = vector.shape_cast %138 : vector<256xf32> to vector<1x256xf32>
    %c0_91 = arith.constant 0 : index
    %c6_92 = arith.constant 6 : index
    %c0_93 = arith.constant 0 : index
    %140 = vector.load %arg4[%c0_91, %c6_92, %c0_93] : memref<1x8x256xf32, #tpu.memory_space<vmem>>, vector<1x1x256xf32>
    %141 = vector.shape_cast %140 : vector<1x1x256xf32> to vector<1x256xf32>
    %142 = vector.shape_cast %139 : vector<1x256xf32> to vector<1x1x256xf32>
    tpu.vector_store %arg4[%c0_91, %c6_92, %c0_93], %142 {strides = array<i32>} : memref<1x8x256xf32, #tpu.memory_space<vmem>>, vector<1x1x256xf32>,
    %c0_94 = arith.constant 0 : index
    %c0_95 = arith.constant 0 : index
    %c7 = arith.constant 7 : index
    %c0_96 = arith.constant 0 : index
    %143 = vector.load %arg1[%c0_94, %c0_95, %c7, %c0_96] : memref<1x2x8x256xi32, #tpu.memory_space<vmem>>, vector<1x1x1x256xi32>
    %144 = vector.shape_cast %143 : vector<1x1x1x256xi32> to vector<1x256xi32>
    %c0_97 = arith.constant 0 : index
    %c1_98 = arith.constant 1 : index
    %c7_99 = arith.constant 7 : index
    %c0_100 = arith.constant 0 : index
    %145 = vector.load %arg1[%c0_97, %c1_98, %c7_99, %c0_100] : memref<1x2x8x256xi32, #tpu.memory_space<vmem>>, vector<1x1x1x256xi32>
    %146 = vector.shape_cast %145 : vector<1x1x1x256xi32> to vector<1x256xi32>
    %147 = vector.broadcast %144 : vector<1x256xi32> to vector<64x256xi32>
    %148 = arith.cmpi eq, %2, %147 : vector<64x256xi32>
    %149 = arith.extui %148 : vector<64x256xi1> to vector<64x256xi32>
    %150 = arith.sitofp %149 : vector<64x256xi32> to vector<64x256xf32>
    %151 = vector.broadcast %146 : vector<1x256xi32> to vector<64x256xi32>
    %152 = arith.cmpi eq, %2, %151 : vector<64x256xi32>
    %153 = arith.extui %152 : vector<64x256xi1> to vector<64x256xi32>
    %154 = arith.sitofp %153 : vector<64x256xi32> to vector<64x256xf32>
    %cst_101 = arith.constant dense<0.000000e+00> : vector<40x256xf32>
    %155 = tpu.matmul %0, %150, %cst_101 {dimension_numbers = #tpu.dot_dimension_numbers<[1], [0], [0], [1], [0, 0, 1, 1], [], []>} : vector<40x64xf32>, vector<64x256xf32>, vector<40x256xf32> -> vector<40x256xf32>
    %cst_102 = arith.constant dense<0.000000e+00> : vector<40x256xf32>
    %156 = tpu.matmul %1, %154, %cst_102 {dimension_numbers = #tpu.dot_dimension_numbers<[1], [0], [0], [1], [0, 0, 1, 1], [], []>} : vector<40x64xf32>, vector<64x256xf32>, vector<40x256xf32> -> vector<40x256xf32>
    %157 = arith.mulf %155, %156 : vector<40x256xf32>
    %cst_103 = arith.constant dense<0.000000e+00> : vector<256xf32>
    %158 = vector.multi_reduction <add>, %157, %cst_103 [0] : vector<40x256xf32> to vector<256xf32>
    %159 = vector.shape_cast %158 : vector<256xf32> to vector<1x256xf32>
    %c0_104 = arith.constant 0 : index
    %c7_105 = arith.constant 7 : index
    %c0_106 = arith.constant 0 : index
    %160 = vector.load %arg4[%c0_104, %c7_105, %c0_106] : memref<1x8x256xf32, #tpu.memory_space<vmem>>, vector<1x1x256xf32>
    %161 = vector.shape_cast %160 : vector<1x1x256xf32> to vector<1x256xf32>
    %162 = vector.shape_cast %159 : vector<1x256xf32> to vector<1x1x256xf32>
    tpu.vector_store %arg4[%c0_104, %c7_105, %c0_106], %162 {strides = array<i32>} : memref<1x8x256xf32, #tpu.memory_space<vmem>>, vector<1x1x256xf32>,
    return
  }
  func.func @transform_0(%arg0: i32) -> (i32, i32, i32, i32) {
    %c0_i32 = arith.constant 0 : i32
    %c0_i32_0 = arith.constant 0 : i32
    %c0_i32_1 = arith.constant 0 : i32
    %c0_i32_2 = arith.constant 0 : i32
    return %arg0, %c0_i32, %c0_i32_0, %c0_i32_1 : i32, i32, i32, i32
  }
  func.func @transform_1(%arg0: i32) -> (i32, i32) {
    %c0_i32 = arith.constant 0 : i32
    %c0_i32_0 = arith.constant 0 : i32
    %c0_i32_1 = arith.constant 0 : i32
    return %c0_i32, %c0_i32_0 : i32, i32
  }
  func.func @transform_2(%arg0: i32) -> (i32, i32) {
    %c0_i32 = arith.constant 0 : i32
    %c0_i32_0 = arith.constant 0 : i32
    %c0_i32_1 = arith.constant 0 : i32
    return %c0_i32, %c0_i32_0 : i32, i32
  }
  func.func @transform_3(%arg0: i32) -> (i32, i32, i32) {
    %c0_i32 = arith.constant 0 : i32
    %c0_i32_0 = arith.constant 0 : i32
    %c0_i32_1 = arith.constant 0 : i32
    return %arg0, %c0_i32, %c0_i32_0 : i32, i32, i32
  }
}

</mosaic_0001>

<bundles_post_ra>
// kernel: tpu_custom_call.1
= control target key start
LH: loop header
LB: loop body
LE: loop exit
PB: predicated region body
PF: predicated region fallthrough
CT: control target
= control target key end

     0   :  { %8 = vsyncpa [#allocation3], 0  ;;  %s4919_s0 = inlined_call_operand.hbm [shape: s32[1,2,8,256], index: 0, kind: input, shape index: {}]   ;;  %s4920_s1 = inlined_call_operand.hbm [shape: f32[40,64], index: 1, kind: input, shape index: {}]   ;;  %s4921_s2 = inlined_call_operand.hbm [shape: f32[40,64], index: 2, kind: input, shape index: {}]   ;;  %s4922_s3 = inlined_call_operand.hbm [shape: f32[1,8,256], index: 3, kind: output, shape index: {}]  }
   0x1   :  { %9 = vsyncpa [#allocation6], 0 }
   0x2   :  { %10 = vsyncpa [#allocation4], 0  ;;  %s3686_s12 = smov [#allocation5]  }
   0x3   :  { %s28_s13 = sshll.u32 %s3686_s12, 4  ;;  %s29_s13 = int_to_ptr.vmem [resolvable:$true] %s28_s13 }
   0x4   :  { %s3608_s14 = scalar_lea.vmem %s29_s13, 640  ;;  %p3613_p1 = scmp.lt.s32.totalorder %s29_s13, %s29_s13 }
   0x5   :  { %p3609_p0 = scmp.ne.s32.totalorder %s29_s13, %s3608_s14  ;;  %p3614_p2 = scmp.lt.s32.totalorder %s3608_s14, %s3608_s14 }
   0x7   :  { %p3615_p3 = por %p3614_p2, %p3613_p1 }
   0x9   :  { %p3616_p4 = pnand %p3615_p3, %p3609_p0 }
   0xb   :  { %3619 = shalt.err (!%p3616_p4)
}
   0xc   :  { %s3687_s15 = smov 128   ;;  %s3688_s16 = smov 8  }
   0xd   :  { %34 = dma.hbm_to_vmem [thread:$0]  %s4920_s1, 640, %s29_s13, [#allocation6], %s3687_s15, %s3687_s15, %s3688_s16  }
   0xe   :  { %s3689_s19 = smov [#allocation2]  }
   0xf   :  { %s16_s20 = sshll.u32 %s3689_s19, 4  ;;  %s17_s20 = int_to_ptr.vmem [resolvable:$true] %s16_s20 }
  0x10   :  { %s3628_s21 = scalar_lea.vmem %s17_s20, 512  ;;  %p3633_p6 = scmp.lt.s32.totalorder %s17_s20, %s17_s20 }
  0x11   :  { %p3629_p5 = scmp.ne.s32.totalorder %s17_s20, %s3628_s21  ;;  %p3634_p7 = scmp.lt.s32.totalorder %s3628_s21, %s3628_s21 }
  0x13   :  { %p3635_p8 = por %p3634_p7, %p3633_p6 }
  0x15   :  { %p3636_p9 = pnand %p3635_p8, %p3629_p5 }
  0x17   :  { %3639 = shalt.err (!%p3636_p9)
}
  0x18   :  { %s3690_s22 = smov 256   ;;  %s3691_s23 = smov 16  }
  0x19   :  { %22 = dma.hbm_to_vmem [thread:$0]  %s4919_s0, 512, %s17_s20, [#allocation3], %s3690_s22, %s3690_s22, %s3691_s23  }
  0x1a   :  { %s3692_s26 = smov [#allocation7]  }
  0x1b   :  { %s40_s27 = sshll.u32 %s3692_s26, 4  ;;  %s41_s27 = int_to_ptr.vmem [resolvable:$true] %s40_s27 }
  0x1c   :  { %s3648_s1 = scalar_lea.vmem %s41_s27, 640  ;;  %p3653_p11 = scmp.lt.s32.totalorder %s41_s27, %s41_s27 }
  0x1d   :  { %p3649_p10 = scmp.ne.s32.totalorder %s41_s27, %s3648_s1  ;;  %p3654_p12 = scmp.lt.s32.totalorder %s3648_s1, %s3648_s1 }
  0x1f   :  { %p3655_p13 = por %p3654_p12, %p3653_p11 }
  0x21   :  { %p3656_p0 = pnand %p3655_p13, %p3649_p10 }
  0x23   :  { %3659 = shalt.err (!%p3656_p0)
}
  0x24   :  { %46 = dma.hbm_to_vmem [thread:$0]  %s4921_s2, 640, %s41_s27, [#allocation6], %s3687_s15, %s3687_s15, %s3688_s16  }
  0x25   :  { %3680 = dma.done.wait [#allocation3], 512  }
  0x26   :  { %3681 = vsyncadd [#allocation3], 4294966784 }
  0x27   :  { %3682 = dma.done.wait [#allocation6], 1280  }
  0x28   :  { %3683 = vsyncadd [#allocation6], 4294966016  ;;  %v66_v0 = vlaneseq  ;;  %v3693_v1 = vmov 0.0   ;;  %v75_v8 = vld [vmem:[#allocation2] ss:$8 sm:$0x3] }
  0x29   :  { %270 = vmatprep.mubr.f32.mxu0 %v3693_v1  ;;  %380 = vmatprep.mubr.f32.mxu1 %v3693_v1  ;;  %v77_v9 = vld [vmem:[#allocation2 + $0x10] ss:$8 sm:$0x3]  ;;  %v3694_v15 = vmov 1.0   ;;  %v3874_v25 = vld [vmem:[#allocation5] sm:$0xff]  ;;  %v3876_v26 = vld [vmem:[#allocation7] sm:$0xff] }
  0x2a   :  { %v3729_v2 = vshrl.u32 %v66_v0, 7  ;;  %v466_v19 = vld [vmem:[#allocation2 + $0x1] ss:$8 sm:$0x3]  ;;  %v3904_v28 = vld [vmem:[#allocation7 + $0x8] sm:$0xff]  ;;  %v3932_v30 = vld [vmem:[#allocation7 + $0x10] sm:$0xff] }
  0x2b   :  { %v468_v20 = vld [vmem:[#allocation2 + $0x11] ss:$8 sm:$0x3]  ;;  %v3902_v27 = vld [vmem:[#allocation5 + $0x8] sm:$0xff]  ;;  %v3966_v32 = vld [vmem:[#allocation7 + $0x18] sm:$0xff]  ;;  %s3696_s0 = smov [#allocation8]  }
  0x2c   :  { %v3732_v3 = vsub.s32 1, %v3729_v2  ;;  %v3735_v4 = vsub.s32 0, %v3729_v2  ;;  %v3738_v5 = vadd.s32 56, %v3729_v2  ;;  %v3741_v6 = vadd.s32 48, %v3729_v2  ;;  %v3930_v29 = vld [vmem:[#allocation5 + $0x10] sm:$0xff]  ;;  %v3964_v31 = vld [vmem:[#allocation5 + $0x18] sm:$0xff] }
  0x2d   :  { %v3744_v7 = vadd.s32 40, %v3729_v2  ;;  %v3759_v14 = vadd.s32 32, %v3729_v2  ;;  %v3786_v16 = vadd.s32 24, %v3729_v2  ;;  %v3801_v17 = vadd.s32 16, %v3729_v2  ;;  %v3992_v35 = vld [vmem:[#allocation5 + $0x20] sm:$0xff]  ;;  %v3994_v36 = vld [vmem:[#allocation7 + $0x20] sm:$0xff] }
  0x2e   :  { %v3747_v10 = vrot.slane %v75_v8, %v3732_v3  ;;  %v3750_v11 = vrot.slane %v77_v9, %v3732_v3  ;;  %v3753_v12 = vrot.slane %v75_v8, %v3735_v4  ;;  %v3756_v13 = vrot.slane %v77_v9, %v3735_v4  ;;  %v823_v33 = vld [vmem:[#allocation2 + $0x2] ss:$8 sm:$0x3]  ;;  %v825_v34 = vld [vmem:[#allocation2 + $0x12] ss:$8 sm:$0x3] }
  0x2f   :  { %v3816_v18 = vadd.s32 8, %v3729_v2  ;;  %v3837_v21 = vrot.slane %v466_v19, %v3735_v4  ;;  %v3846_v22 = vrot.slane %v466_v19, %v3732_v3  ;;  %v3855_v23 = vrot.slane %v468_v20, %v3732_v3  ;;  %v1180_v41 = vld [vmem:[#allocation2 + $0x3] ss:$8 sm:$0x3]  ;;  %s2970_s2 = sshll.u32 %s3696_s0, 4  ;;  %s2971_s2 = int_to_ptr.vmem [resolvable:$true] %s2970_s2 }
  0x30   :  { %vm101_vm0 = vcmp.eq.s32.totalorder %v3738_v5, %v3747_v10  ;;  %vm157_vm1 = vcmp.eq.s32.totalorder %v3738_v5, %v3750_v11  ;;  %vm100_vm2 = vcmp.eq.s32.totalorder %v3738_v5, %v3753_v12  ;;  %vm156_vm3 = vcmp.eq.s32.totalorder %v3738_v5, %v3756_v13  ;;  %v1182_v42 = vld [vmem:[#allocation2 + $0x13] ss:$8 sm:$0x3]  ;;  %v1537_v47 = vld [vmem:[#allocation2 + $0x4] ss:$8 sm:$0x3]  ;;  %p3665_p2 = scmp.lt.s32.totalorder %s2971_s2, %s2971_s2 }
  0x31   :  { %3019 = vmatprep.subr.msk.mxu0 %vm101_vm0, %v3694_v15  ;;  %3040 = vmatprep.subr.msk.mxu1 %vm157_vm1, %v3694_v15  ;;  %vm99_vm4 = vcmp.eq.s32.totalorder %v3741_v6, %v3747_v10  ;;  %vm155_vm5 = vcmp.eq.s32.totalorder %v3741_v6, %v3750_v11  ;;  %vm98_vm6 = vcmp.eq.s32.totalorder %v3741_v6, %v3753_v12  ;;  %v1539_v48 = vld [vmem:[#allocation2 + $0x14] ss:$8 sm:$0x3]  ;;  %v1894_v53 = vld [vmem:[#allocation2 + $0x5] ss:$8 sm:$0x3] }
  0x32   :  { %3020 = vmatpush1.msk.msra.mxu0 %vm100_vm2, %v3694_v15  ;;  %3041 = vmatpush1.msk.msra.mxu1 %vm156_vm3, %v3694_v15  ;;  %vm154_vm7 = vcmp.eq.s32.totalorder %v3741_v6, %v3756_v13  ;;  %vm97_vm8 = vcmp.eq.s32.totalorder %v3744_v7, %v3747_v10  ;;  %vm153_vm9 = vcmp.eq.s32.totalorder %v3744_v7, %v3750_v11  ;;  %v1896_v54 = vld [vmem:[#allocation2 + $0x15] ss:$8 sm:$0x3]  ;;  %v2251_v59 = vld [vmem:[#allocation2 + $0x6] ss:$8 sm:$0x3] }
  0x33   :  { %3021 = vmatprep.subr.msk.mxu0 %vm99_vm4, %v3694_v15  ;;  %3042 = vmatprep.subr.msk.mxu1 %vm155_vm5, %v3694_v15  ;;  %vm96_vm10 = vcmp.eq.s32.totalorder %v3744_v7, %v3753_v12  ;;  %vm152_vm11 = vcmp.eq.s32.totalorder %v3744_v7, %v3756_v13  ;;  %vm95_vm12 = vcmp.eq.s32.totalorder %v3759_v14, %v3747_v10  ;;  %v2253_v60 = vld [vmem:[#allocation2 + $0x16] ss:$8 sm:$0x3]  ;;  %v2608_v9 = vld [vmem:[#allocation2 + $0x7] ss:$8 sm:$0x3] }
  0x34   :  { %3022 = vmatpush1.msk.msra.mxu0 %vm98_vm6, %v3694_v15  ;;  %3043 = vmatpush1.msk.msra.mxu1 %vm154_vm7, %v3694_v15  ;;  %vm151_vm13 = vcmp.eq.s32.totalorder %v3759_v14, %v3750_v11  ;;  %vm94_vm14 = vcmp.eq.s32.totalorder %v3759_v14, %v3753_v12  ;;  %vm150_vm15 = vcmp.eq.s32.totalorder %v3759_v14, %v3756_v13  ;;  %s3660_s30 = scalar_lea.vmem %s2971_s2, 256 }
  0x35   :  { %3023 = vmatprep.subr.msk.mxu0 %vm97_vm8, %v3694_v15  ;;  %3044 = vmatprep.subr.msk.mxu1 %vm153_vm9, %v3694_v15  ;;  %vm93_vm0 = vcmp.eq.s32.totalorder %v3786_v16, %v3747_v10  ;;  %vm149_vm1 = vcmp.eq.s32.totalorder %v3786_v16, %v3750_v11  ;;  %vm92_vm2 = vcmp.eq.s32.totalorder %v3786_v16, %v3753_v12  ;;  %p3661_p1 = scmp.ne.s32.totalorder %s2971_s2, %s3660_s30  ;;  %p3666_p3 = scmp.lt.s32.totalorder %s3660_s30, %s3660_s30 }
  0x36   :  { %3024 = vmatpush1.msk.msra.mxu0 %vm96_vm10, %v3694_v15  ;;  %3045 = vmatpush1.msk.msra.mxu1 %vm152_vm11, %v3694_v15  ;;  %vm148_vm3 = vcmp.eq.s32.totalorder %v3786_v16, %v3756_v13  ;;  %vm91_vm4 = vcmp.eq.s32.totalorder %v3801_v17, %v3747_v10  ;;  %vm147_vm5 = vcmp.eq.s32.totalorder %v3801_v17, %v3750_v11 }
  0x37   :  { %3025 = vmatprep.subr.msk.mxu0 %vm95_vm12, %v3694_v15  ;;  %3046 = vmatprep.subr.msk.mxu1 %vm151_vm13, %v3694_v15  ;;  %vm90_vm6 = vcmp.eq.s32.totalorder %v3801_v17, %v3753_v12  ;;  %vm146_vm7 = vcmp.eq.s32.totalorder %v3801_v17, %v3756_v13  ;;  %vm89_vm8 = vcmp.eq.s32.totalorder %v3816_v18, %v3747_v10  ;;  %p3667_p4 = por %p3666_p3, %p3665_p2 }
  0x38   :  { %3026 = vmatpush1.msk.msra.mxu0 %vm94_vm14, %v3694_v15  ;;  %3047 = vmatpush1.msk.msra.mxu1 %vm150_vm15, %v3694_v15  ;;  %vm145_vm9 = vcmp.eq.s32.totalorder %v3816_v18, %v3750_v11  ;;  %vm88_vm10 = vcmp.eq.s32.totalorder %v3816_v18, %v3753_v12  ;;  %vm144_vm11 = vcmp.eq.s32.totalorder %v3816_v18, %v3756_v13 }
  0x39   :  { %3027 = vmatprep.subr.msk.mxu0 %vm93_vm0, %v3694_v15  ;;  %3048 = vmatprep.subr.msk.mxu1 %vm149_vm1, %v3694_v15  ;;  %vm87_vm12 = vcmp.eq.s32.totalorder %v3729_v2, %v3747_v10  ;;  %vm143_vm13 = vcmp.eq.s32.totalorder %v3729_v2, %v3750_v11  ;;  %v3864_v24 = vrot.slane %v468_v20, %v3735_v4  ;;  %vm190_vm0 = vcmask 523264   ;;  %v2610_v10 = vld [vmem:[#allocation2 + $0x17] ss:$8 sm:$0x3]  ;;  %p3668_p5 = pnand %p3667_p4, %p3661_p1 }
  0x3a   :  { %3028 = vmatpush1.msk.msra.mxu0 %vm92_vm2, %v3694_v15  ;;  %3049 = vmatpush1.msk.msra.mxu1 %vm148_vm3, %v3694_v15  ;;  %vm86_vm14 = vcmp.eq.s32.totalorder %v3729_v2, %v3753_v12  ;;  %vm142_vm15 = vcmp.eq.s32.totalorder %v3729_v2, %v3756_v13  ;;  %vm492_vm1 = vcmp.eq.s32.totalorder %v3738_v5, %v3846_v22  ;;  %v4766_v20 = vld [vmem:[#allocation7 + $0x8] sm:$0xff] }
  0x3b   :  { %3029 = vmatprep.subr.msk.mxu0 %vm91_vm4, %v3694_v15  ;;  %3050 = vmatprep.subr.msk.mxu1 %vm147_vm5, %v3694_v15  ;;  %vm548_vm2 = vcmp.eq.s32.totalorder %v3738_v5, %v3855_v23  ;;  %vm491_vm3 = vcmp.eq.s32.totalorder %v3738_v5, %v3837_v21  ;;  %vm547_vm4 = vcmp.eq.s32.totalorder %v3738_v5, %v3864_v24 }
  0x3c   :  { %3030 = vmatpush1.msk.msra.mxu0 %vm90_vm6, %v3694_v15  ;;  %3051 = vmatpush1.msk.msra.mxu1 %vm146_vm7, %v3694_v15  ;;  %vm490_vm5 = vcmp.eq.s32.totalorder %v3741_v6, %v3846_v22  ;;  %vm546_vm6 = vcmp.eq.s32.totalorder %v3741_v6, %v3855_v23  ;;  %vm489_vm7 = vcmp.eq.s32.totalorder %v3741_v6, %v3837_v21 }
  0x3d   :  { %3031 = vmatprep.subr.msk.mxu0 %vm89_vm8, %v3694_v15  ;;  %3052 = vmatprep.subr.msk.mxu1 %vm145_vm9, %v3694_v15  ;;  %vm545_vm8 = vcmp.eq.s32.totalorder %v3741_v6, %v3864_v24  ;;  %vm488_vm9 = vcmp.eq.s32.totalorder %v3744_v7, %v3846_v22  ;;  %v4009_v37 = vrot.slane %v823_v33, %v3732_v3 }
  0x3e   :  { %3032 = vmatpush1.msk.msra.mxu0 %vm88_vm10, %v3694_v15  ;;  %3053 = vmatpush1.msk.msra.mxu1 %vm144_vm11, %v3694_v15  ;;  %vm544_vm10 = vcmp.eq.s32.totalorder %v3744_v7, %v3855_v23  ;;  %vm487_vm11 = vcmp.eq.s32.totalorder %v3744_v7, %v3837_v21  ;;  %v4012_v38 = vrot.slane %v825_v34, %v3732_v3 }
  0x3f   :  { %3033 = vmatprep.subr.msk.mxu0 %vm87_vm12, %v3694_v15  ;;  %3054 = vmatprep.subr.msk.mxu1 %vm143_vm13, %v3694_v15  ;;  %vm543_vm12 = vcmp.eq.s32.totalorder %v3744_v7, %v3864_v24  ;;  %vm486_vm13 = vcmp.eq.s32.totalorder %v3759_v14, %v3846_v22  ;;  %v4021_v39 = vrot.slane %v823_v33, %v3735_v4 }
  0x40   :  { %3034 = vmatpush1.msk.msra.mxu0 %vm86_vm14, %v3694_v15  ;;  %3055 = vmatpush1.msk.msra.mxu1 %vm142_vm15, %v3694_v15  ;;  %vm542_vm14 = vcmp.eq.s32.totalorder %v3759_v14, %v3855_v23  ;;  %vm485_vm15 = vcmp.eq.s32.totalorder %v3759_v14, %v3837_v21  ;;  %v4024_v40 = vrot.slane %v825_v34, %v3735_v4 }
  0x41   :  { %3035 = vmatmul.mubr.msk.f32.vlgmr.msra.gmra.mxu0 %vm190_vm0, %v3874_v25  ;;  %3056 = vmatmul.mubr.msk.f32.vlgmr.msra.gmra.mxu1 %vm190_vm0, %v3876_v26  ;;  %v4147_v43 = vrot.slane %v1180_v41, %v3732_v3  ;;  %v4150_v44 = vrot.slane %v1182_v42, %v3732_v3  ;;  %v4159_v45 = vrot.slane %v1180_v41, %v3735_v4 }
  0x42   :  { %3093 = vmatprep.subr.msk.mxu0 %vm492_vm1, %v3694_v15  ;;  %3114 = vmatprep.subr.msk.mxu1 %vm548_vm2, %v3694_v15  ;;  %vm541_vm1 = vcmp.eq.s32.totalorder %v3759_v14, %v3864_v24  ;;  %vm484_vm2 = vcmp.eq.s32.totalorder %v3786_v16, %v3846_v22  ;;  %v4162_v46 = vrot.slane %v1182_v42, %v3735_v4 }
  0x43   :  { %3094 = vmatpush1.msk.msra.mxu0 %vm491_vm3, %v3694_v15  ;;  %3115 = vmatpush1.msk.msra.mxu1 %vm547_vm4, %v3694_v15  ;;  %vm540_vm3 = vcmp.eq.s32.totalorder %v3786_v16, %v3855_v23  ;;  %vm483_vm4 = vcmp.eq.s32.totalorder %v3786_v16, %v3837_v21  ;;  %v4285_v49 = vrot.slane %v1537_v47, %v3732_v3 }
  0x44   :  { %276 = vmatprep.mubr.f32.mxu0 %v3693_v1  ;;  %386 = vmatprep.mubr.f32.mxu1 %v3693_v1  ;;  %v4288_v50 = vrot.slane %v1539_v48, %v3732_v3  ;;  %v4297_v51 = vrot.slane %v1537_v47, %v3735_v4  ;;  %v4300_v52 = vrot.slane %v1539_v48, %v3735_v4 }
  0x45   :  { %3095 = vmatprep.subr.msk.mxu0 %vm490_vm5, %v3694_v15  ;;  %3116 = vmatprep.subr.msk.mxu1 %vm546_vm6, %v3694_v15  ;;  %vm539_vm5 = vcmp.eq.s32.totalorder %v3786_v16, %v3864_v24  ;;  %vm482_vm6 = vcmp.eq.s32.totalorder %v3801_v17, %v3846_v22  ;;  %v4423_v55 = vrot.slane %v1894_v53, %v3732_v3 }
  0x46   :  { %3036 = vmatmul.mubr.msk.f32.gmra.mxu0 %vm190_vm0, %v3902_v27  ;;  %3057 = vmatmul.mubr.msk.f32.gmra.mxu1 %vm190_vm0, %v3904_v28  ;;  %v4426_v56 = vrot.slane %v1896_v54, %v3732_v3  ;;  %v4435_v57 = vrot.slane %v1894_v53, %v3735_v4  ;;  %v4438_v58 = vrot.slane %v1896_v54, %v3735_v4 }
  0x47   :  { %3096 = vmatpush1.msk.msra.mxu0 %vm489_vm7, %v3694_v15  ;;  %3117 = vmatpush1.msk.msra.mxu1 %vm545_vm8, %v3694_v15  ;;  %vm538_vm7 = vcmp.eq.s32.totalorder %v3801_v17, %v3855_v23  ;;  %vm481_vm8 = vcmp.eq.s32.totalorder %v3801_v17, %v3837_v21  ;;  %v4561_v61 = vrot.slane %v2251_v59, %v3732_v3 }
  0x48   :  { %3097 = vmatprep.subr.msk.mxu0 %vm488_vm9, %v3694_v15  ;;  %3118 = vmatprep.subr.msk.mxu1 %vm544_vm10, %v3694_v15  ;;  %vm537_vm9 = vcmp.eq.s32.totalorder %v3801_v17, %v3864_v24  ;;  %vm480_vm10 = vcmp.eq.s32.totalorder %v3816_v18, %v3846_v22  ;;  %v4564_v62 = vrot.slane %v2253_v60, %v3732_v3 }
  0x49   :  { %3098 = vmatpush1.msk.msra.mxu0 %vm487_vm11, %v3694_v15  ;;  %3119 = vmatpush1.msk.msra.mxu1 %vm543_vm12, %v3694_v15  ;;  %vm536_vm11 = vcmp.eq.s32.totalorder %v3816_v18, %v3855_v23  ;;  %vm479_vm12 = vcmp.eq.s32.totalorder %v3816_v18, %v3837_v21  ;;  %v4573_v63 = vrot.slane %v2251_v59, %v3735_v4 }
  0x4a   :  { %282 = vmatprep.mubr.f32.mxu0 %v3693_v1  ;;  %392 = vmatprep.mubr.f32.mxu1 %v3693_v1  ;;  %v4576_v8 = vrot.slane %v2253_v60, %v3735_v4  ;;  %v4699_v11 = vrot.slane %v2608_v9, %v3732_v3  ;;  %v4702_v12 = vrot.slane %v2610_v10, %v3732_v3  ;;  %v4734_v3 = vld [vmem:[#allocation5] sm:$0xff] }
  0x4b   :  { %3037 = vmatmul.mubr.msk.f32.gmra.mxu0 %vm190_vm0, %v3930_v29  ;;  %3058 = vmatmul.mubr.msk.f32.gmra.mxu1 %vm190_vm0, %v3932_v30  ;;  %v4711_v13 = vrot.slane %v2608_v9, %v3735_v4  ;;  %v4714_v19 = vrot.slane %v2610_v10, %v3735_v4  ;;  %v4738_v4 = vld [vmem:[#allocation7] sm:$0xff]  ;;  %v3695_v10 = vmov 1966171168  }
  0x4c   :  { %3099 = vmatprep.subr.msk.mxu0 %vm486_vm13, %v3694_v15  ;;  %3120 = vmatprep.subr.msk.mxu1 %vm542_vm14, %v3694_v15  ;;  %vm535_vm13 = vcmp.eq.s32.totalorder %v3816_v18, %v3864_v24  ;;  %vm478_vm14 = vcmp.eq.s32.totalorder %v3729_v2, %v3846_v22 }
  0x4d   :  { %3100 = vmatpush1.msk.msra.mxu0 %vm485_vm15, %v3694_v15  ;;  %3121 = vmatpush1.msk.msra.mxu1 %vm541_vm1, %v3694_v15  ;;  %vm534_vm15 = vcmp.eq.s32.totalorder %v3729_v2, %v3855_v23  ;;  %vm477_vm1 = vcmp.eq.s32.totalorder %v3729_v2, %v3837_v21  ;;  %v3599_v21 = vld [vmem:[#allocation7 + $0x20] sm:$0xff] }
  0x4e   :  { %3101 = vmatprep.subr.msk.mxu0 %vm484_vm2, %v3694_v15  ;;  %3122 = vmatprep.subr.msk.mxu1 %vm540_vm3, %v3694_v15  ;;  %vm533_vm2 = vcmp.eq.s32.totalorder %v3729_v2, %v3864_v24  ;;  %vm849_vm3 = vcmp.eq.s32.totalorder %v3738_v5, %v4009_v37 }
  0x4f   :  { %288 = vmatprep.mubr.f32.mxu0 %v3693_v1  ;;  %398 = vmatprep.mubr.f32.mxu1 %v3693_v1 }
  0x50   :  { %3102 = vmatpush1.msk.msra.mxu0 %vm483_vm4, %v3694_v15  ;;  %3123 = vmatpush1.msk.msra.mxu1 %vm539_vm5, %v3694_v15  ;;  %vm905_vm4 = vcmp.eq.s32.totalorder %v3738_v5, %v4012_v38  ;;  %vm848_vm5 = vcmp.eq.s32.totalorder %v3738_v5, %v4021_v39 }
  0x51   :  { %3038 = vmatmul.mubr.msk.f32.gmra.mxu0 %vm190_vm0, %v3964_v31  ;;  %3059 = vmatmul.mubr.msk.f32.gmra.mxu1 %vm190_vm0, %v3966_v32 }
  0x52   :  { %3103 = vmatprep.subr.msk.mxu0 %vm482_vm6, %v3694_v15  ;;  %3124 = vmatprep.subr.msk.mxu1 %vm538_vm7, %v3694_v15  ;;  %vm904_vm6 = vcmp.eq.s32.totalorder %v3738_v5, %v4024_v40  ;;  %vm847_vm7 = vcmp.eq.s32.totalorder %v3741_v6, %v4009_v37 }
  0x53   :  { %3104 = vmatpush1.msk.msra.mxu0 %vm481_vm8, %v3694_v15  ;;  %3125 = vmatpush1.msk.msra.mxu1 %vm537_vm9, %v3694_v15  ;;  %vm903_vm8 = vcmp.eq.s32.totalorder %v3741_v6, %v4012_v38  ;;  %vm846_vm9 = vcmp.eq.s32.totalorder %v3741_v6, %v4021_v39 }
  0x54   :  { %294 = vmatprep.mubr.f32.mxu0 %v3693_v1  ;;  %404 = vmatprep.mubr.f32.mxu1 %v3693_v1 }
  0x55   :  { %3105 = vmatprep.subr.msk.mxu0 %vm480_vm10, %v3694_v15  ;;  %3126 = vmatprep.subr.msk.mxu1 %vm536_vm11, %v3694_v15  ;;  %vm902_vm10 = vcmp.eq.s32.totalorder %v3741_v6, %v4024_v40  ;;  %vm845_vm11 = vcmp.eq.s32.totalorder %v3744_v7, %v4009_v37 }
  0x56   :  { %3039 = vmatmul.mubr.msk.f32.gmra.mxu0 %vm190_vm0, %v3992_v35  ;;  %3060 = vmatmul.mubr.msk.f32.gmra.mxu1 %vm190_vm0, %v3994_v36 }
  0x57   :  { %3106 = vmatpush1.msk.msra.mxu0 %vm479_vm12, %v3694_v15  ;;  %3127 = vmatpush1.msk.msra.mxu1 %vm535_vm13, %v3694_v15  ;;  %vm901_vm12 = vcmp.eq.s32.totalorder %v3744_v7, %v4012_v38  ;;  %vm844_vm13 = vcmp.eq.s32.totalorder %v3744_v7, %v4021_v39 }
  0x58   :  { %3107 = vmatprep.subr.msk.mxu0 %vm478_vm14, %v3694_v15  ;;  %3128 = vmatprep.subr.msk.mxu1 %vm534_vm15, %v3694_v15  ;;  %vm900_vm14 = vcmp.eq.s32.totalorder %v3744_v7, %v4024_v40  ;;  %vm843_vm15 = vcmp.eq.s32.totalorder %v3759_v14, %v4009_v37 }
  0x59   :  { %3108 = vmatpush1.msk.msra.mxu0 %vm477_vm1, %v3694_v15  ;;  %645 = vmatprep.mubr.f32.mxu0 %v3693_v1  ;;  %vm899_vm1 = vcmp.eq.s32.totalorder %v3759_v14, %v4012_v38 }
  0x5a   :  { %3129 = vmatpush1.msk.msra.mxu1 %vm533_vm2, %v3694_v15  ;;  %740 = vmatprep.mubr.f32.mxu1 %v3693_v1  ;;  %vm842_vm2 = vcmp.eq.s32.totalorder %v3759_v14, %v4021_v39 }
  0x5b   :  { %3109 = vmatmul.mubr.msk.f32.vlgmr.msra.gmra.mxu0 %vm190_vm0, %v3874_v25  ;;  %3130 = vmatmul.mubr.msk.f32.vlgmr.msra.gmra.mxu1 %vm190_vm0, %v3876_v26 }
  0x5c   :  { %3167 = vmatprep.subr.msk.mxu0 %vm849_vm3, %v3694_v15  ;;  %3188 = vmatprep.subr.msk.mxu1 %vm905_vm4, %v3694_v15  ;;  %vm898_vm3 = vcmp.eq.s32.totalorder %v3759_v14, %v4024_v40  ;;  %vm841_vm4 = vcmp.eq.s32.totalorder %v3786_v16, %v4009_v37 }
  0x5d   :  { %3168 = vmatpush1.msk.msra.mxu0 %vm848_vm5, %v3694_v15  ;;  %3189 = vmatpush1.msk.msra.mxu1 %vm904_vm6, %v3694_v15  ;;  %vm897_vm5 = vcmp.eq.s32.totalorder %v3786_v16, %v4012_v38  ;;  %vm840_vm6 = vcmp.eq.s32.totalorder %v3786_v16, %v4021_v39 }
  0x5e   :  { %651 = vmatprep.mubr.f32.mxu0 %v3693_v1  ;;  %746 = vmatprep.mubr.f32.mxu1 %v3693_v1 }
  0x5f   :  { %3169 = vmatprep.subr.msk.mxu0 %vm847_vm7, %v3694_v15  ;;  %3190 = vmatprep.subr.msk.mxu1 %vm903_vm8, %v3694_v15  ;;  %vm896_vm7 = vcmp.eq.s32.totalorder %v3786_v16, %v4024_v40  ;;  %vm839_vm8 = vcmp.eq.s32.totalorder %v3801_v17, %v4009_v37 }
  0x60   :  { %3110 = vmatmul.mubr.msk.f32.gmra.mxu0 %vm190_vm0, %v3902_v27  ;;  %3131 = vmatmul.mubr.msk.f32.gmra.mxu1 %vm190_vm0, %v3904_v28 }
  0x61   :  { %3170 = vmatpush1.msk.msra.mxu0 %vm846_vm9, %v3694_v15  ;;  %3191 = vmatpush1.msk.msra.mxu1 %vm902_vm10, %v3694_v15  ;;  %vm895_vm9 = vcmp.eq.s32.totalorder %v3801_v17, %v4012_v38  ;;  %vm838_vm10 = vcmp.eq.s32.totalorder %v3801_v17, %v4021_v39 }
  0x62   :  { %3171 = vmatprep.subr.msk.mxu0 %vm845_vm11, %v3694_v15  ;;  %3192 = vmatprep.subr.msk.mxu1 %vm901_vm12, %v3694_v15  ;;  %vm894_vm11 = vcmp.eq.s32.totalorder %v3801_v17, %v4024_v40  ;;  %vm837_vm12 = vcmp.eq.s32.totalorder %v3816_v18, %v4009_v37 }
  0x63   :  { %3172 = vmatpush1.msk.msra.mxu0 %vm844_vm13, %v3694_v15  ;;  %3193 = vmatpush1.msk.msra.mxu1 %vm900_vm14, %v3694_v15  ;;  %vm893_vm13 = vcmp.eq.s32.totalorder %v3816_v18, %v4012_v38  ;;  %vm836_vm14 = vcmp.eq.s32.totalorder %v3816_v18, %v4021_v39 }
  0x64   :  { %657 = vmatprep.mubr.f32.mxu0 %v3693_v1  ;;  %752 = vmatprep.mubr.f32.mxu1 %v3693_v1 }
  0x65   :  { %3111 = vmatmul.mubr.msk.f32.gmra.mxu0 %vm190_vm0, %v3930_v29  ;;  %3132 = vmatmul.mubr.msk.f32.gmra.mxu1 %vm190_vm0, %v3932_v30 }
  0x66   :  { %3173 = vmatprep.subr.msk.mxu0 %vm843_vm15, %v3694_v15  ;;  %3194 = vmatprep.subr.msk.mxu1 %vm899_vm1, %v3694_v15  ;;  %vm892_vm15 = vcmp.eq.s32.totalorder %v3816_v18, %v4024_v40  ;;  %vm835_vm1 = vcmp.eq.s32.totalorder %v3729_v2, %v4009_v37 }
  0x67   :  { %3174 = vmatpush1.msk.msra.mxu0 %vm842_vm2, %v3694_v15  ;;  %3195 = vmatpush1.msk.msra.mxu1 %vm898_vm3, %v3694_v15  ;;  %vm891_vm2 = vcmp.eq.s32.totalorder %v3729_v2, %v4012_v38  ;;  %vm834_vm3 = vcmp.eq.s32.totalorder %v3729_v2, %v4021_v39 }
  0x68   :  { %3175 = vmatprep.subr.msk.mxu0 %vm841_vm4, %v3694_v15  ;;  %3196 = vmatprep.subr.msk.mxu1 %vm897_vm5, %v3694_v15  ;;  %vm890_vm4 = vcmp.eq.s32.totalorder %v3729_v2, %v4024_v40  ;;  %vm1206_vm5 = vcmp.eq.s32.totalorder %v3738_v5, %v4147_v43 }
  0x69   :  { %663 = vmatprep.mubr.f32.mxu0 %v3693_v1  ;;  %758 = vmatprep.mubr.f32.mxu1 %v3693_v1 }
  0x6a   :  { %3176 = vmatpush1.msk.msra.mxu0 %vm840_vm6, %v3694_v15  ;;  %3197 = vmatpush1.msk.msra.mxu1 %vm896_vm7, %v3694_v15  ;;  %vm1262_vm6 = vcmp.eq.s32.totalorder %v3738_v5, %v4150_v44  ;;  %vm1205_vm7 = vcmp.eq.s32.totalorder %v3738_v5, %v4159_v45 }
  0x6b   :  { %3112 = vmatmul.mubr.msk.f32.gmra.mxu0 %vm190_vm0, %v3964_v31  ;;  %3133 = vmatmul.mubr.msk.f32.gmra.mxu1 %vm190_vm0, %v3966_v32 }
  0x6c   :  { %3177 = vmatprep.subr.msk.mxu0 %vm839_vm8, %v3694_v15  ;;  %3198 = vmatprep.subr.msk.mxu1 %vm895_vm9, %v3694_v15  ;;  %vm1261_vm8 = vcmp.eq.s32.totalorder %v3738_v5, %v4162_v46  ;;  %vm1204_vm9 = vcmp.eq.s32.totalorder %v3741_v6, %v4147_v43 }
  0x6d   :  { %3178 = vmatpush1.msk.msra.mxu0 %vm838_vm10, %v3694_v15  ;;  %3199 = vmatpush1.msk.msra.mxu1 %vm894_vm11, %v3694_v15  ;;  %vm1260_vm10 = vcmp.eq.s32.totalorder %v3741_v6, %v4150_v44  ;;  %vm1203_vm11 = vcmp.eq.s32.totalorder %v3741_v6, %v4159_v45 }
  0x6e   :  { %669 = vmatprep.mubr.f32.mxu0 %v3693_v1  ;;  %764 = vmatprep.mubr.f32.mxu1 %v3693_v1 }
  0x6f   :  { %3179 = vmatprep.subr.msk.mxu0 %vm837_vm12, %v3694_v15  ;;  %3200 = vmatprep.subr.msk.mxu1 %vm893_vm13, %v3694_v15  ;;  %vm1259_vm12 = vcmp.eq.s32.totalorder %v3741_v6, %v4162_v46  ;;  %vm1202_vm13 = vcmp.eq.s32.totalorder %v3744_v7, %v4147_v43 }
  0x70   :  { %3113 = vmatmul.mubr.msk.f32.gmra.mxu0 %vm190_vm0, %v3992_v35  ;;  %3134 = vmatmul.mubr.msk.f32.gmra.mxu1 %vm190_vm0, %v3994_v36 }
  0x71   :  { %3180 = vmatpush1.msk.msra.mxu0 %vm836_vm14, %v3694_v15  ;;  %3201 = vmatpush1.msk.msra.mxu1 %vm892_vm15, %v3694_v15  ;;  %vm1258_vm14 = vcmp.eq.s32.totalorder %v3744_v7, %v4150_v44  ;;  %vm1201_vm15 = vcmp.eq.s32.totalorder %v3744_v7, %v4159_v45 }
  0x72   :  { %3181 = vmatprep.subr.msk.mxu0 %vm835_vm1, %v3694_v15  ;;  %3202 = vmatprep.subr.msk.mxu1 %vm891_vm2, %v3694_v15  ;;  %vm1257_vm1 = vcmp.eq.s32.totalorder %v3744_v7, %v4162_v46  ;;  %vm1200_vm2 = vcmp.eq.s32.totalorder %v3759_v14, %v4147_v43 }
  0x73   :  { %3182 = vmatpush1.msk.msra.mxu0 %vm834_vm3, %v3694_v15  ;;  %1002 = vmatprep.mubr.f32.mxu0 %v3693_v1  ;;  %vm1256_vm3 = vcmp.eq.s32.totalorder %v3759_v14, %v4150_v44 }
  0x74   :  { %3203 = vmatpush1.msk.msra.mxu1 %vm890_vm4, %v3694_v15  ;;  %1097 = vmatprep.mubr.f32.mxu1 %v3693_v1  ;;  %vm1199_vm4 = vcmp.eq.s32.totalorder %v3759_v14, %v4159_v45 }
  0x75   :  { %3183 = vmatmul.mubr.msk.f32.vlgmr.msra.gmra.mxu0 %vm190_vm0, %v3874_v25  ;;  %3204 = vmatmul.mubr.msk.f32.vlgmr.msra.gmra.mxu1 %vm190_vm0, %v3876_v26 }
  0x76   :  { %3241 = vmatprep.subr.msk.mxu0 %vm1206_vm5, %v3694_v15  ;;  %3262 = vmatprep.subr.msk.mxu1 %vm1262_vm6, %v3694_v15  ;;  %vm1255_vm5 = vcmp.eq.s32.totalorder %v3759_v14, %v4162_v46  ;;  %vm1198_vm6 = vcmp.eq.s32.totalorder %v3786_v16, %v4147_v43 }
  0x77   :  { %3242 = vmatpush1.msk.msra.mxu0 %vm1205_vm7, %v3694_v15  ;;  %3263 = vmatpush1.msk.msra.mxu1 %vm1261_vm8, %v3694_v15  ;;  %vm1254_vm7 = vcmp.eq.s32.totalorder %v3786_v16, %v4150_v44  ;;  %vm1197_vm8 = vcmp.eq.s32.totalorder %v3786_v16, %v4159_v45 }
  0x78   :  { %1008 = vmatprep.mubr.f32.mxu0 %v3693_v1  ;;  %1103 = vmatprep.mubr.f32.mxu1 %v3693_v1 }
  0x79   :  { %3243 = vmatprep.subr.msk.mxu0 %vm1204_vm9, %v3694_v15  ;;  %3264 = vmatprep.subr.msk.mxu1 %vm1260_vm10, %v3694_v15  ;;  %vm1253_vm9 = vcmp.eq.s32.totalorder %v3786_v16, %v4162_v46  ;;  %vm1196_vm10 = vcmp.eq.s32.totalorder %v3801_v17, %v4147_v43 }
  0x7a   :  { %3184 = vmatmul.mubr.msk.f32.gmra.mxu0 %vm190_vm0, %v3902_v27  ;;  %3205 = vmatmul.mubr.msk.f32.gmra.mxu1 %vm190_vm0, %v3904_v28 }
  0x7b   :  { %3244 = vmatpush1.msk.msra.mxu0 %vm1203_vm11, %v3694_v15  ;;  %3265 = vmatpush1.msk.msra.mxu1 %vm1259_vm12, %v3694_v15  ;;  %vm1252_vm11 = vcmp.eq.s32.totalorder %v3801_v17, %v4150_v44  ;;  %vm1195_vm12 = vcmp.eq.s32.totalorder %v3801_v17, %v4159_v45 }
  0x7c   :  { %3245 = vmatprep.subr.msk.mxu0 %vm1202_vm13, %v3694_v15  ;;  %3266 = vmatprep.subr.msk.mxu1 %vm1258_vm14, %v3694_v15  ;;  %vm1251_vm13 = vcmp.eq.s32.totalorder %v3801_v17, %v4162_v46  ;;  %vm1194_vm14 = vcmp.eq.s32.totalorder %v3816_v18, %v4147_v43 }
  0x7d   :  { %3246 = vmatpush1.msk.msra.mxu0 %vm1201_vm15, %v3694_v15  ;;  %3267 = vmatpush1.msk.msra.mxu1 %vm1257_vm1, %v3694_v15  ;;  %vm1250_vm15 = vcmp.eq.s32.totalorder %v3816_v18, %v4150_v44  ;;  %vm1193_vm1 = vcmp.eq.s32.totalorder %v3816_v18, %v4159_v45 }
  0x7e   :  { %1014 = vmatprep.mubr.f32.mxu0 %v3693_v1  ;;  %1109 = vmatprep.mubr.f32.mxu1 %v3693_v1 }
  0x7f   :  { %3185 = vmatmul.mubr.msk.f32.gmra.mxu0 %vm190_vm0, %v3930_v29  ;;  %3206 = vmatmul.mubr.msk.f32.gmra.mxu1 %vm190_vm0, %v3932_v30 }
  0x80   :  { %3247 = vmatprep.subr.msk.mxu0 %vm1200_vm2, %v3694_v15  ;;  %3268 = vmatprep.subr.msk.mxu1 %vm1256_vm3, %v3694_v15  ;;  %vm1249_vm2 = vcmp.eq.s32.totalorder %v3816_v18, %v4162_v46  ;;  %vm1192_vm3 = vcmp.eq.s32.totalorder %v3729_v2, %v4147_v43 }
  0x81   :  { %3248 = vmatpush1.msk.msra.mxu0 %vm1199_vm4, %v3694_v15  ;;  %3269 = vmatpush1.msk.msra.mxu1 %vm1255_vm5, %v3694_v15  ;;  %vm1248_vm4 = vcmp.eq.s32.totalorder %v3729_v2, %v4150_v44  ;;  %vm1191_vm5 = vcmp.eq.s32.totalorder %v3729_v2, %v4159_v45 }
  0x82   :  { %3249 = vmatprep.subr.msk.mxu0 %vm1198_vm6, %v3694_v15  ;;  %3270 = vmatprep.subr.msk.mxu1 %vm1254_vm7, %v3694_v15  ;;  %vm1247_vm6 = vcmp.eq.s32.totalorder %v3729_v2, %v4162_v46  ;;  %vm1563_vm7 = vcmp.eq.s32.totalorder %v3738_v5, %v4285_v49 }
  0x83   :  { %1020 = vmatprep.mubr.f32.mxu0 %v3693_v1  ;;  %1115 = vmatprep.mubr.f32.mxu1 %v3693_v1 }
  0x84   :  { %3250 = vmatpush1.msk.msra.mxu0 %vm1197_vm8, %v3694_v15  ;;  %3271 = vmatpush1.msk.msra.mxu1 %vm1253_vm9, %v3694_v15  ;;  %vm1619_vm8 = vcmp.eq.s32.totalorder %v3738_v5, %v4288_v50  ;;  %vm1562_vm9 = vcmp.eq.s32.totalorder %v3738_v5, %v4297_v51 }
  0x85   :  { %3186 = vmatmul.mubr.msk.f32.gmra.mxu0 %vm190_vm0, %v3964_v31  ;;  %3207 = vmatmul.mubr.msk.f32.gmra.mxu1 %vm190_vm0, %v3966_v32 }
  0x86   :  { %3251 = vmatprep.subr.msk.mxu0 %vm1196_vm10, %v3694_v15  ;;  %3272 = vmatprep.subr.msk.mxu1 %vm1252_vm11, %v3694_v15  ;;  %vm1618_vm10 = vcmp.eq.s32.totalorder %v3738_v5, %v4300_v52  ;;  %vm1561_vm11 = vcmp.eq.s32.totalorder %v3741_v6, %v4285_v49 }
  0x87   :  { %3252 = vmatpush1.msk.msra.mxu0 %vm1195_vm12, %v3694_v15  ;;  %3273 = vmatpush1.msk.msra.mxu1 %vm1251_vm13, %v3694_v15  ;;  %vm1617_vm12 = vcmp.eq.s32.totalorder %v3741_v6, %v4288_v50  ;;  %vm1560_vm13 = vcmp.eq.s32.totalorder %v3741_v6, %v4297_v51 }
  0x88   :  { %1026 = vmatprep.mubr.f32.mxu0 %v3693_v1  ;;  %1121 = vmatprep.mubr.f32.mxu1 %v3693_v1 }
  0x89   :  { %3253 = vmatprep.subr.msk.mxu0 %vm1194_vm14, %v3694_v15  ;;  %3274 = vmatprep.subr.msk.mxu1 %vm1250_vm15, %v3694_v15  ;;  %vm1616_vm14 = vcmp.eq.s32.totalorder %v3741_v6, %v4300_v52  ;;  %vm1559_vm15 = vcmp.eq.s32.totalorder %v3744_v7, %v4285_v49 }
  0x8a   :  { %3187 = vmatmul.mubr.msk.f32.gmra.mxu0 %vm190_vm0, %v3992_v35  ;;  %3208 = vmatmul.mubr.msk.f32.gmra.mxu1 %vm190_vm0, %v3994_v36 }
  0x8b   :  { %3254 = vmatpush1.msk.msra.mxu0 %vm1193_vm1, %v3694_v15  ;;  %3275 = vmatpush1.msk.msra.mxu1 %vm1249_vm2, %v3694_v15  ;;  %vm1615_vm1 = vcmp.eq.s32.totalorder %v3744_v7, %v4288_v50  ;;  %vm1558_vm2 = vcmp.eq.s32.totalorder %v3744_v7, %v4297_v51 }
  0x8c   :  { %3255 = vmatprep.subr.msk.mxu0 %vm1192_vm3, %v3694_v15  ;;  %3276 = vmatprep.subr.msk.mxu1 %vm1248_vm4, %v3694_v15  ;;  %vm1614_vm3 = vcmp.eq.s32.totalorder %v3744_v7, %v4300_v52  ;;  %vm1557_vm4 = vcmp.eq.s32.totalorder %v3759_v14, %v4285_v49 }
  0x8d   :  { %3256 = vmatpush1.msk.msra.mxu0 %vm1191_vm5, %v3694_v15  ;;  %1359 = vmatprep.mubr.f32.mxu0 %v3693_v1  ;;  %vm1613_vm5 = vcmp.eq.s32.totalorder %v3759_v14, %v4288_v50 }
  0x8e   :  { %3277 = vmatpush1.msk.msra.mxu1 %vm1247_vm6, %v3694_v15  ;;  %1454 = vmatprep.mubr.f32.mxu1 %v3693_v1  ;;  %vm1556_vm6 = vcmp.eq.s32.totalorder %v3759_v14, %v4297_v51 }
  0x8f   :  { %3257 = vmatmul.mubr.msk.f32.vlgmr.msra.gmra.mxu0 %vm190_vm0, %v3874_v25  ;;  %3278 = vmatmul.mubr.msk.f32.vlgmr.msra.gmra.mxu1 %vm190_vm0, %v3876_v26 }
  0x90   :  { %3315 = vmatprep.subr.msk.mxu0 %vm1563_vm7, %v3694_v15  ;;  %3336 = vmatprep.subr.msk.mxu1 %vm1619_vm8, %v3694_v15  ;;  %vm1612_vm7 = vcmp.eq.s32.totalorder %v3759_v14, %v4300_v52  ;;  %vm1555_vm8 = vcmp.eq.s32.totalorder %v3786_v16, %v4285_v49 }
  0x91   :  { %3316 = vmatpush1.msk.msra.mxu0 %vm1562_vm9, %v3694_v15  ;;  %3337 = vmatpush1.msk.msra.mxu1 %vm1618_vm10, %v3694_v15  ;;  %vm1611_vm9 = vcmp.eq.s32.totalorder %v3786_v16, %v4288_v50  ;;  %vm1554_vm10 = vcmp.eq.s32.totalorder %v3786_v16, %v4297_v51 }
  0x92   :  { %1365 = vmatprep.mubr.f32.mxu0 %v3693_v1  ;;  %1460 = vmatprep.mubr.f32.mxu1 %v3693_v1 }
  0x93   :  { %3317 = vmatprep.subr.msk.mxu0 %vm1561_vm11, %v3694_v15  ;;  %3338 = vmatprep.subr.msk.mxu1 %vm1617_vm12, %v3694_v15  ;;  %vm1610_vm11 = vcmp.eq.s32.totalorder %v3786_v16, %v4300_v52  ;;  %vm1553_vm12 = vcmp.eq.s32.totalorder %v3801_v17, %v4285_v49 }
  0x94   :  { %3258 = vmatmul.mubr.msk.f32.gmra.mxu0 %vm190_vm0, %v3902_v27  ;;  %3279 = vmatmul.mubr.msk.f32.gmra.mxu1 %vm190_vm0, %v3904_v28 }
  0x95   :  { %3318 = vmatpush1.msk.msra.mxu0 %vm1560_vm13, %v3694_v15  ;;  %3339 = vmatpush1.msk.msra.mxu1 %vm1616_vm14, %v3694_v15  ;;  %vm1609_vm13 = vcmp.eq.s32.totalorder %v3801_v17, %v4288_v50  ;;  %vm1552_vm14 = vcmp.eq.s32.totalorder %v3801_v17, %v4297_v51 }
  0x96   :  { %3319 = vmatprep.subr.msk.mxu0 %vm1559_vm15, %v3694_v15  ;;  %3340 = vmatprep.subr.msk.mxu1 %vm1615_vm1, %v3694_v15  ;;  %vm1608_vm15 = vcmp.eq.s32.totalorder %v3801_v17, %v4300_v52  ;;  %vm1551_vm1 = vcmp.eq.s32.totalorder %v3816_v18, %v4285_v49 }
  0x97   :  { %3320 = vmatpush1.msk.msra.mxu0 %vm1558_vm2, %v3694_v15  ;;  %3341 = vmatpush1.msk.msra.mxu1 %vm1614_vm3, %v3694_v15  ;;  %vm1607_vm2 = vcmp.eq.s32.totalorder %v3816_v18, %v4288_v50  ;;  %vm1550_vm3 = vcmp.eq.s32.totalorder %v3816_v18, %v4297_v51 }
  0x98   :  { %1371 = vmatprep.mubr.f32.mxu0 %v3693_v1  ;;  %1466 = vmatprep.mubr.f32.mxu1 %v3693_v1 }
  0x99   :  { %3259 = vmatmul.mubr.msk.f32.gmra.mxu0 %vm190_vm0, %v3930_v29  ;;  %3280 = vmatmul.mubr.msk.f32.gmra.mxu1 %vm190_vm0, %v3932_v30 }
  0x9a   :  { %3321 = vmatprep.subr.msk.mxu0 %vm1557_vm4, %v3694_v15  ;;  %3342 = vmatprep.subr.msk.mxu1 %vm1613_vm5, %v3694_v15  ;;  %vm1606_vm4 = vcmp.eq.s32.totalorder %v3816_v18, %v4300_v52  ;;  %vm1549_vm5 = vcmp.eq.s32.totalorder %v3729_v2, %v4285_v49 }
  0x9b   :  { %3322 = vmatpush1.msk.msra.mxu0 %vm1556_vm6, %v3694_v15  ;;  %3343 = vmatpush1.msk.msra.mxu1 %vm1612_vm7, %v3694_v15  ;;  %vm1605_vm6 = vcmp.eq.s32.totalorder %v3729_v2, %v4288_v50  ;;  %vm1548_vm7 = vcmp.eq.s32.totalorder %v3729_v2, %v4297_v51 }
  0x9c   :  { %3323 = vmatprep.subr.msk.mxu0 %vm1555_vm8, %v3694_v15  ;;  %3344 = vmatprep.subr.msk.mxu1 %vm1611_vm9, %v3694_v15  ;;  %vm1604_vm8 = vcmp.eq.s32.totalorder %v3729_v2, %v4300_v52  ;;  %vm1920_vm9 = vcmp.eq.s32.totalorder %v3738_v5, %v4423_v55 }
  0x9d   :  { %1377 = vmatprep.mubr.f32.mxu0 %v3693_v1  ;;  %1472 = vmatprep.mubr.f32.mxu1 %v3693_v1 }
  0x9e   :  { %3324 = vmatpush1.msk.msra.mxu0 %vm1554_vm10, %v3694_v15  ;;  %3345 = vmatpush1.msk.msra.mxu1 %vm1610_vm11, %v3694_v15  ;;  %vm1976_vm10 = vcmp.eq.s32.totalorder %v3738_v5, %v4426_v56  ;;  %vm1919_vm11 = vcmp.eq.s32.totalorder %v3738_v5, %v4435_v57 }
  0x9f   :  { %3260 = vmatmul.mubr.msk.f32.gmra.mxu0 %vm190_vm0, %v3964_v31  ;;  %3281 = vmatmul.mubr.msk.f32.gmra.mxu1 %vm190_vm0, %v3966_v32 }
  0xa0   :  { %3325 = vmatprep.subr.msk.mxu0 %vm1553_vm12, %v3694_v15  ;;  %3346 = vmatprep.subr.msk.mxu1 %vm1609_vm13, %v3694_v15  ;;  %vm1975_vm12 = vcmp.eq.s32.totalorder %v3738_v5, %v4438_v58  ;;  %vm1918_vm13 = vcmp.eq.s32.totalorder %v3741_v6, %v4423_v55 }
  0xa1   :  { %3326 = vmatpush1.msk.msra.mxu0 %vm1552_vm14, %v3694_v15  ;;  %3347 = vmatpush1.msk.msra.mxu1 %vm1608_vm15, %v3694_v15  ;;  %vm1974_vm14 = vcmp.eq.s32.totalorder %v3741_v6, %v4426_v56  ;;  %vm1917_vm15 = vcmp.eq.s32.totalorder %v3741_v6, %v4435_v57 }
  0xa2   :  { %1383 = vmatprep.mubr.f32.mxu0 %v3693_v1  ;;  %1478 = vmatprep.mubr.f32.mxu1 %v3693_v1 }
  0xa3   :  { %3327 = vmatprep.subr.msk.mxu0 %vm1551_vm1, %v3694_v15  ;;  %3348 = vmatprep.subr.msk.mxu1 %vm1607_vm2, %v3694_v15  ;;  %vm1973_vm1 = vcmp.eq.s32.totalorder %v3741_v6, %v4438_v58  ;;  %vm1916_vm2 = vcmp.eq.s32.totalorder %v3744_v7, %v4423_v55 }
  0xa4   :  { %3261 = vmatmul.mubr.msk.f32.gmra.mxu0 %vm190_vm0, %v3992_v35  ;;  %3282 = vmatmul.mubr.msk.f32.gmra.mxu1 %vm190_vm0, %v3994_v36 }
  0xa5   :  { %3328 = vmatpush1.msk.msra.mxu0 %vm1550_vm3, %v3694_v15  ;;  %3349 = vmatpush1.msk.msra.mxu1 %vm1606_vm4, %v3694_v15  ;;  %vm1972_vm3 = vcmp.eq.s32.totalorder %v3744_v7, %v4426_v56  ;;  %vm1915_vm4 = vcmp.eq.s32.totalorder %v3744_v7, %v4435_v57 }
  0xa6   :  { %3329 = vmatprep.subr.msk.mxu0 %vm1549_vm5, %v3694_v15  ;;  %3350 = vmatprep.subr.msk.mxu1 %vm1605_vm6, %v3694_v15  ;;  %vm1971_vm5 = vcmp.eq.s32.totalorder %v3744_v7, %v4438_v58  ;;  %vm1914_vm6 = vcmp.eq.s32.totalorder %v3759_v14, %v4423_v55 }
  0xa7   :  { %3330 = vmatpush1.msk.msra.mxu0 %vm1548_vm7, %v3694_v15  ;;  %1716 = vmatprep.mubr.f32.mxu0 %v3693_v1  ;;  %vm1970_vm7 = vcmp.eq.s32.totalorder %v3759_v14, %v4426_v56 }
  0xa8   :  { %3351 = vmatpush1.msk.msra.mxu1 %vm1604_vm8, %v3694_v15  ;;  %1811 = vmatprep.mubr.f32.mxu1 %v3693_v1  ;;  %vm1913_vm8 = vcmp.eq.s32.totalorder %v3759_v14, %v4435_v57 }
  0xa9   :  { %3331 = vmatmul.mubr.msk.f32.vlgmr.msra.gmra.mxu0 %vm190_vm0, %v3874_v25  ;;  %3352 = vmatmul.mubr.msk.f32.vlgmr.msra.gmra.mxu1 %vm190_vm0, %v3876_v26 }
  0xaa   :  { %3389 = vmatprep.subr.msk.mxu0 %vm1920_vm9, %v3694_v15  ;;  %3410 = vmatprep.subr.msk.mxu1 %vm1976_vm10, %v3694_v15  ;;  %vm1969_vm9 = vcmp.eq.s32.totalorder %v3759_v14, %v4438_v58  ;;  %vm1912_vm10 = vcmp.eq.s32.totalorder %v3786_v16, %v4423_v55 }
  0xab   :  { %3390 = vmatpush1.msk.msra.mxu0 %vm1919_vm11, %v3694_v15  ;;  %3411 = vmatpush1.msk.msra.mxu1 %vm1975_vm12, %v3694_v15  ;;  %vm1968_vm11 = vcmp.eq.s32.totalorder %v3786_v16, %v4426_v56  ;;  %vm1911_vm12 = vcmp.eq.s32.totalorder %v3786_v16, %v4435_v57 }
  0xac   :  { %1722 = vmatprep.mubr.f32.mxu0 %v3693_v1  ;;  %1817 = vmatprep.mubr.f32.mxu1 %v3693_v1 }
  0xad   :  { %3391 = vmatprep.subr.msk.mxu0 %vm1918_vm13, %v3694_v15  ;;  %3412 = vmatprep.subr.msk.mxu1 %vm1974_vm14, %v3694_v15  ;;  %vm1967_vm13 = vcmp.eq.s32.totalorder %v3786_v16, %v4438_v58  ;;  %vm1910_vm14 = vcmp.eq.s32.totalorder %v3801_v17, %v4423_v55 }
  0xae   :  { %3332 = vmatmul.mubr.msk.f32.gmra.mxu0 %vm190_vm0, %v3902_v27  ;;  %3353 = vmatmul.mubr.msk.f32.gmra.mxu1 %vm190_vm0, %v3904_v28 }
  0xaf   :  { %3392 = vmatpush1.msk.msra.mxu0 %vm1917_vm15, %v3694_v15  ;;  %3413 = vmatpush1.msk.msra.mxu1 %vm1973_vm1, %v3694_v15  ;;  %vm1966_vm15 = vcmp.eq.s32.totalorder %v3801_v17, %v4426_v56  ;;  %vm1909_vm1 = vcmp.eq.s32.totalorder %v3801_v17, %v4435_v57 }
  0xb0   :  { %3393 = vmatprep.subr.msk.mxu0 %vm1916_vm2, %v3694_v15  ;;  %3414 = vmatprep.subr.msk.mxu1 %vm1972_vm3, %v3694_v15  ;;  %vm1965_vm2 = vcmp.eq.s32.totalorder %v3801_v17, %v4438_v58  ;;  %vm1908_vm3 = vcmp.eq.s32.totalorder %v3816_v18, %v4423_v55 }
  0xb1   :  { %3394 = vmatpush1.msk.msra.mxu0 %vm1915_vm4, %v3694_v15  ;;  %3415 = vmatpush1.msk.msra.mxu1 %vm1971_vm5, %v3694_v15  ;;  %vm1964_vm4 = vcmp.eq.s32.totalorder %v3816_v18, %v4426_v56  ;;  %vm1907_vm5 = vcmp.eq.s32.totalorder %v3816_v18, %v4435_v57 }
  0xb2   :  { %1728 = vmatprep.mubr.f32.mxu0 %v3693_v1  ;;  %1823 = vmatprep.mubr.f32.mxu1 %v3693_v1 }
  0xb3   :  { %3333 = vmatmul.mubr.msk.f32.gmra.mxu0 %vm190_vm0, %v3930_v29  ;;  %3354 = vmatmul.mubr.msk.f32.gmra.mxu1 %vm190_vm0, %v3932_v30 }
  0xb4   :  { %3395 = vmatprep.subr.msk.mxu0 %vm1914_vm6, %v3694_v15  ;;  %3416 = vmatprep.subr.msk.mxu1 %vm1970_vm7, %v3694_v15  ;;  %vm1963_vm6 = vcmp.eq.s32.totalorder %v3816_v18, %v4438_v58  ;;  %vm1906_vm7 = vcmp.eq.s32.totalorder %v3729_v2, %v4423_v55 }
  0xb5   :  { %3396 = vmatpush1.msk.msra.mxu0 %vm1913_vm8, %v3694_v15  ;;  %3417 = vmatpush1.msk.msra.mxu1 %vm1969_vm9, %v3694_v15  ;;  %vm1962_vm8 = vcmp.eq.s32.totalorder %v3729_v2, %v4426_v56  ;;  %vm1905_vm9 = vcmp.eq.s32.totalorder %v3729_v2, %v4435_v57 }
  0xb6   :  { %3397 = vmatprep.subr.msk.mxu0 %vm1912_vm10, %v3694_v15  ;;  %3418 = vmatprep.subr.msk.mxu1 %vm1968_vm11, %v3694_v15  ;;  %vm1961_vm10 = vcmp.eq.s32.totalorder %v3729_v2, %v4438_v58  ;;  %vm2277_vm11 = vcmp.eq.s32.totalorder %v3738_v5, %v4561_v61 }
  0xb7   :  { %1734 = vmatprep.mubr.f32.mxu0 %v3693_v1  ;;  %1829 = vmatprep.mubr.f32.mxu1 %v3693_v1 }
  0xb8   :  { %3398 = vmatpush1.msk.msra.mxu0 %vm1911_vm12, %v3694_v15  ;;  %3419 = vmatpush1.msk.msra.mxu1 %vm1967_vm13, %v3694_v15  ;;  %vm2333_vm12 = vcmp.eq.s32.totalorder %v3738_v5, %v4564_v62  ;;  %vm2276_vm13 = vcmp.eq.s32.totalorder %v3738_v5, %v4573_v63 }
  0xb9   :  { %3334 = vmatmul.mubr.msk.f32.gmra.mxu0 %vm190_vm0, %v3964_v31  ;;  %3355 = vmatmul.mubr.msk.f32.gmra.mxu1 %vm190_vm0, %v3966_v32 }
  0xba   :  { %3399 = vmatprep.subr.msk.mxu0 %vm1910_vm14, %v3694_v15  ;;  %3420 = vmatprep.subr.msk.mxu1 %vm1966_vm15, %v3694_v15  ;;  %vm2332_vm14 = vcmp.eq.s32.totalorder %v3738_v5, %v4576_v8  ;;  %vm2275_vm15 = vcmp.eq.s32.totalorder %v3741_v6, %v4561_v61 }
  0xbb   :  { %3400 = vmatpush1.msk.msra.mxu0 %vm1909_vm1, %v3694_v15  ;;  %3421 = vmatpush1.msk.msra.mxu1 %vm1965_vm2, %v3694_v15  ;;  %vm2331_vm1 = vcmp.eq.s32.totalorder %v3741_v6, %v4564_v62  ;;  %vm2274_vm2 = vcmp.eq.s32.totalorder %v3741_v6, %v4573_v63 }
  0xbc   :  { %1740 = vmatprep.mubr.f32.mxu0 %v3693_v1  ;;  %1835 = vmatprep.mubr.f32.mxu1 %v3693_v1 }
  0xbd   :  { %3401 = vmatprep.subr.msk.mxu0 %vm1908_vm3, %v3694_v15  ;;  %3422 = vmatprep.subr.msk.mxu1 %vm1964_vm4, %v3694_v15  ;;  %vm2330_vm3 = vcmp.eq.s32.totalorder %v3741_v6, %v4576_v8  ;;  %vm2273_vm4 = vcmp.eq.s32.totalorder %v3744_v7, %v4561_v61 }
  0xbe   :  { %3335 = vmatmul.mubr.msk.f32.gmra.mxu0 %vm190_vm0, %v3992_v35  ;;  %3356 = vmatmul.mubr.msk.f32.gmra.mxu1 %vm190_vm0, %v3994_v36 }
  0xbf   :  { %3402 = vmatpush1.msk.msra.mxu0 %vm1907_vm5, %v3694_v15  ;;  %3423 = vmatpush1.msk.msra.mxu1 %vm1963_vm6, %v3694_v15  ;;  %vm2329_vm5 = vcmp.eq.s32.totalorder %v3744_v7, %v4564_v62  ;;  %vm2272_vm6 = vcmp.eq.s32.totalorder %v3744_v7, %v4573_v63 }
  0xc0   :  { %3403 = vmatprep.subr.msk.mxu0 %vm1906_vm7, %v3694_v15  ;;  %3424 = vmatprep.subr.msk.mxu1 %vm1962_vm8, %v3694_v15  ;;  %vm2328_vm7 = vcmp.eq.s32.totalorder %v3744_v7, %v4576_v8  ;;  %vm2271_vm8 = vcmp.eq.s32.totalorder %v3759_v14, %v4561_v61 }
  0xc1   :  { %3404 = vmatpush1.msk.msra.mxu0 %vm1905_vm9, %v3694_v15  ;;  %2073 = vmatprep.mubr.f32.mxu0 %v3693_v1  ;;  %vm2327_vm9 = vcmp.eq.s32.totalorder %v3759_v14, %v4564_v62 }
  0xc2   :  { %3425 = vmatpush1.msk.msra.mxu1 %vm1961_vm10, %v3694_v15  ;;  %2168 = vmatprep.mubr.f32.mxu1 %v3693_v1  ;;  %vm2270_vm10 = vcmp.eq.s32.totalorder %v3759_v14, %v4573_v63 }
  0xc3   :  { %3405 = vmatmul.mubr.msk.f32.vlgmr.msra.gmra.mxu0 %vm190_vm0, %v3874_v25  ;;  %3426 = vmatmul.mubr.msk.f32.vlgmr.msra.gmra.mxu1 %vm190_vm0, %v3876_v26 }
  0xc4   :  { %3463 = vmatprep.subr.msk.mxu0 %vm2277_vm11, %v3694_v15  ;;  %3484 = vmatprep.subr.msk.mxu1 %vm2333_vm12, %v3694_v15  ;;  %vm2326_vm11 = vcmp.eq.s32.totalorder %v3759_v14, %v4576_v8  ;;  %vm2269_vm12 = vcmp.eq.s32.totalorder %v3786_v16, %v4561_v61 }
  0xc5   :  { %3464 = vmatpush1.msk.msra.mxu0 %vm2276_vm13, %v3694_v15  ;;  %3485 = vmatpush1.msk.msra.mxu1 %vm2332_vm14, %v3694_v15  ;;  %vm2325_vm13 = vcmp.eq.s32.totalorder %v3786_v16, %v4564_v62  ;;  %vm2268_vm14 = vcmp.eq.s32.totalorder %v3786_v16, %v4573_v63 }
  0xc6   :  { %2079 = vmatprep.mubr.f32.mxu0 %v3693_v1  ;;  %2174 = vmatprep.mubr.f32.mxu1 %v3693_v1 }
  0xc7   :  { %3465 = vmatprep.subr.msk.mxu0 %vm2275_vm15, %v3694_v15  ;;  %3486 = vmatprep.subr.msk.mxu1 %vm2331_vm1, %v3694_v15  ;;  %vm2324_vm15 = vcmp.eq.s32.totalorder %v3786_v16, %v4576_v8  ;;  %vm2267_vm1 = vcmp.eq.s32.totalorder %v3801_v17, %v4561_v61 }
  0xc8   :  { %3406 = vmatmul.mubr.msk.f32.gmra.mxu0 %vm190_vm0, %v3902_v27  ;;  %3427 = vmatmul.mubr.msk.f32.gmra.mxu1 %vm190_vm0, %v3904_v28 }
  0xc9   :  { %3466 = vmatpush1.msk.msra.mxu0 %vm2274_vm2, %v3694_v15  ;;  %3487 = vmatpush1.msk.msra.mxu1 %vm2330_vm3, %v3694_v15  ;;  %vm2323_vm2 = vcmp.eq.s32.totalorder %v3801_v17, %v4564_v62  ;;  %vm2266_vm3 = vcmp.eq.s32.totalorder %v3801_v17, %v4573_v63 }
  0xca   :  { %3467 = vmatprep.subr.msk.mxu0 %vm2273_vm4, %v3694_v15  ;;  %3488 = vmatprep.subr.msk.mxu1 %vm2329_vm5, %v3694_v15  ;;  %vm2322_vm4 = vcmp.eq.s32.totalorder %v3801_v17, %v4576_v8  ;;  %vm2265_vm5 = vcmp.eq.s32.totalorder %v3816_v18, %v4561_v61 }
  0xcb   :  { %3468 = vmatpush1.msk.msra.mxu0 %vm2272_vm6, %v3694_v15  ;;  %3489 = vmatpush1.msk.msra.mxu1 %vm2328_vm7, %v3694_v15  ;;  %vm2321_vm6 = vcmp.eq.s32.totalorder %v3816_v18, %v4564_v62  ;;  %vm2264_vm7 = vcmp.eq.s32.totalorder %v3816_v18, %v4573_v63 }
  0xcc   :  { %2085 = vmatprep.mubr.f32.mxu0 %v3693_v1  ;;  %2180 = vmatprep.mubr.f32.mxu1 %v3693_v1 }
  0xcd   :  { %3407 = vmatmul.mubr.msk.f32.gmra.mxu0 %vm190_vm0, %v3930_v29  ;;  %3428 = vmatmul.mubr.msk.f32.gmra.mxu1 %vm190_vm0, %v3932_v30 }
  0xce   :  { %3469 = vmatprep.subr.msk.mxu0 %vm2271_vm8, %v3694_v15  ;;  %3490 = vmatprep.subr.msk.mxu1 %vm2327_vm9, %v3694_v15  ;;  %vm2320_vm8 = vcmp.eq.s32.totalorder %v3816_v18, %v4576_v8  ;;  %vm2263_vm9 = vcmp.eq.s32.totalorder %v3729_v2, %v4561_v61 }
  0xcf   :  { %3470 = vmatpush1.msk.msra.mxu0 %vm2270_vm10, %v3694_v15  ;;  %3491 = vmatpush1.msk.msra.mxu1 %vm2326_vm11, %v3694_v15  ;;  %vm2319_vm10 = vcmp.eq.s32.totalorder %v3729_v2, %v4564_v62  ;;  %vm2262_vm11 = vcmp.eq.s32.totalorder %v3729_v2, %v4573_v63 }
  0xd0   :  { %3471 = vmatprep.subr.msk.mxu0 %vm2269_vm12, %v3694_v15  ;;  %3492 = vmatprep.subr.msk.mxu1 %vm2325_vm13, %v3694_v15  ;;  %vm2318_vm12 = vcmp.eq.s32.totalorder %v3729_v2, %v4576_v8  ;;  %vm2634_vm13 = vcmp.eq.s32.totalorder %v3738_v5, %v4699_v11 }
  0xd1   :  { %2091 = vmatprep.mubr.f32.mxu0 %v3693_v1  ;;  %2186 = vmatprep.mubr.f32.mxu1 %v3693_v1 }
  0xd2   :  { %3472 = vmatpush1.msk.msra.mxu0 %vm2268_vm14, %v3694_v15  ;;  %3493 = vmatpush1.msk.msra.mxu1 %vm2324_vm15, %v3694_v15  ;;  %vm2690_vm14 = vcmp.eq.s32.totalorder %v3738_v5, %v4702_v12  ;;  %vm2633_vm15 = vcmp.eq.s32.totalorder %v3738_v5, %v4711_v13 }
  0xd3   :  { %3408 = vmatmul.mubr.msk.f32.gmra.mxu0 %vm190_vm0, %v3964_v31  ;;  %3429 = vmatmul.mubr.msk.f32.gmra.mxu1 %vm190_vm0, %v3966_v32 }
  0xd4   :  { %3473 = vmatprep.subr.msk.mxu0 %vm2267_vm1, %v3694_v15  ;;  %3494 = vmatprep.subr.msk.mxu1 %vm2323_vm2, %v3694_v15  ;;  %vm2689_vm1 = vcmp.eq.s32.totalorder %v3738_v5, %v4714_v19  ;;  %vm2632_vm2 = vcmp.eq.s32.totalorder %v3741_v6, %v4699_v11  ;;  %v4762_v5 = vld [vmem:[#allocation5 + $0x8] sm:$0xff] }
  0xd5   :  { %3474 = vmatpush1.msk.msra.mxu0 %vm2266_vm3, %v3694_v15  ;;  %3495 = vmatpush1.msk.msra.mxu1 %vm2322_vm4, %v3694_v15  ;;  %vm2688_vm3 = vcmp.eq.s32.totalorder %v3741_v6, %v4702_v12  ;;  %vm2631_vm4 = vcmp.eq.s32.totalorder %v3741_v6, %v4711_v13 }
  0xd6   :  { %2097 = vmatprep.mubr.f32.mxu0 %v3693_v1  ;;  %2192 = vmatprep.mubr.f32.mxu1 %v3693_v1 }
  0xd7   :  { %3475 = vmatprep.subr.msk.mxu0 %vm2265_vm5, %v3694_v15  ;;  %3496 = vmatprep.subr.msk.mxu1 %vm2321_vm6, %v3694_v15  ;;  %vm2687_vm5 = vcmp.eq.s32.totalorder %v3741_v6, %v4714_v19  ;;  %vm2630_vm6 = vcmp.eq.s32.totalorder %v3744_v7, %v4699_v11  ;;  %v3594_v6 = vld [vmem:[#allocation5 + $0x10] sm:$0xff] }
  0xd8   :  { %3409 = vmatmul.mubr.msk.f32.gmra.mxu0 %vm190_vm0, %v3992_v35  ;;  %3430 = vmatmul.mubr.msk.f32.gmra.mxu1 %vm190_vm0, %v3994_v36 }
  0xd9   :  { %3476 = vmatpush1.msk.msra.mxu0 %vm2264_vm7, %v3694_v15  ;;  %3497 = vmatpush1.msk.msra.mxu1 %vm2320_vm8, %v3694_v15  ;;  %vm2686_vm7 = vcmp.eq.s32.totalorder %v3744_v7, %v4702_v12  ;;  %vm2629_vm8 = vcmp.eq.s32.totalorder %v3744_v7, %v4711_v13 }
  0xda   :  { %3477 = vmatprep.subr.msk.mxu0 %vm2263_vm9, %v3694_v15  ;;  %3498 = vmatprep.subr.msk.mxu1 %vm2319_vm10, %v3694_v15  ;;  %vm2685_vm9 = vcmp.eq.s32.totalorder %v3744_v7, %v4714_v19  ;;  %vm2628_vm10 = vcmp.eq.s32.totalorder %v3759_v14, %v4699_v11  ;;  %v3595_v7 = vld [vmem:[#allocation7 + $0x10] sm:$0xff] }
  0xdb   :  { %3478 = vmatpush1.msk.msra.mxu0 %vm2262_vm11, %v3694_v15  ;;  %2430 = vmatprep.mubr.f32.mxu0 %v3693_v1  ;;  %vm2684_vm11 = vcmp.eq.s32.totalorder %v3759_v14, %v4702_v12 }
  0xdc   :  { %3499 = vmatpush1.msk.msra.mxu1 %vm2318_vm12, %v3694_v15  ;;  %2525 = vmatprep.mubr.f32.mxu1 %v3693_v1  ;;  %vm2627_vm12 = vcmp.eq.s32.totalorder %v3759_v14, %v4711_v13 }
  0xdd   :  { %3479 = vmatmul.mubr.msk.f32.vlgmr.msra.gmra.mxu0 %vm190_vm0, %v4734_v3  ;;  %3500 = vmatmul.mubr.msk.f32.vlgmr.msra.gmra.mxu1 %vm190_vm0, %v4738_v4 }
  0xde   :  { %3537 = vmatprep.subr.msk.mxu0 %vm2634_vm13, %v3694_v15  ;;  %3558 = vmatprep.subr.msk.mxu1 %vm2690_vm14, %v3694_v15  ;;  %vm2683_vm13 = vcmp.eq.s32.totalorder %v3759_v14, %v4714_v19  ;;  %vm2626_vm14 = vcmp.eq.s32.totalorder %v3786_v16, %v4699_v11  ;;  %v3596_v14 = vld [vmem:[#allocation5 + $0x18] sm:$0xff] }
  0xdf   :  { %3538 = vmatpush1.msk.msra.mxu0 %vm2633_vm15, %v3694_v15  ;;  %3559 = vmatpush1.msk.msra.mxu1 %vm2689_vm1, %v3694_v15  ;;  %vm2682_vm15 = vcmp.eq.s32.totalorder %v3786_v16, %v4702_v12  ;;  %vm2625_vm1 = vcmp.eq.s32.totalorder %v3786_v16, %v4711_v13 }
  0xe0   :  { %2436 = vmatprep.mubr.f32.mxu0 %v3693_v1  ;;  %2531 = vmatprep.mubr.f32.mxu1 %v3693_v1 }
  0xe1   :  { %3539 = vmatprep.subr.msk.mxu0 %vm2632_vm2, %v3694_v15  ;;  %3560 = vmatprep.subr.msk.mxu1 %vm2688_vm3, %v3694_v15  ;;  %vm2681_vm2 = vcmp.eq.s32.totalorder %v3786_v16, %v4714_v19  ;;  %vm2624_vm3 = vcmp.eq.s32.totalorder %v3801_v17, %v4699_v11  ;;  %v3597_v16 = vld [vmem:[#allocation7 + $0x18] sm:$0xff] }
  0xe2   :  { %3480 = vmatmul.mubr.msk.f32.gmra.mxu0 %vm190_vm0, %v4762_v5  ;;  %3501 = vmatmul.mubr.msk.f32.gmra.mxu1 %vm190_vm0, %v4766_v20 }
  0xe3   :  { %3540 = vmatpush1.msk.msra.mxu0 %vm2631_vm4, %v3694_v15  ;;  %3561 = vmatpush1.msk.msra.mxu1 %vm2687_vm5, %v3694_v15  ;;  %vm2680_vm4 = vcmp.eq.s32.totalorder %v3801_v17, %v4702_v12  ;;  %vm2623_vm5 = vcmp.eq.s32.totalorder %v3801_v17, %v4711_v13 }
  0xe4   :  { %3541 = vmatprep.subr.msk.mxu0 %vm2630_vm6, %v3694_v15  ;;  %3562 = vmatprep.subr.msk.mxu1 %vm2686_vm7, %v3694_v15  ;;  %vm2679_vm6 = vcmp.eq.s32.totalorder %v3801_v17, %v4714_v19  ;;  %vm2622_vm7 = vcmp.eq.s32.totalorder %v3816_v18, %v4699_v11  ;;  %v3598_v17 = vld [vmem:[#allocation5 + $0x20] sm:$0xff] }
  0xe5   :  { %3542 = vmatpush1.msk.msra.mxu0 %vm2629_vm8, %v3694_v15  ;;  %3563 = vmatpush1.msk.msra.mxu1 %vm2685_vm9, %v3694_v15  ;;  %vm2678_vm8 = vcmp.eq.s32.totalorder %v3816_v18, %v4702_v12  ;;  %vm2621_vm9 = vcmp.eq.s32.totalorder %v3816_v18, %v4711_v13 }
  0xe6   :  { %2442 = vmatprep.mubr.f32.mxu0 %v3693_v1  ;;  %2537 = vmatprep.mubr.f32.mxu1 %v3693_v1 }
  0xe7   :  { %3481 = vmatmul.mubr.msk.f32.gmra.mxu0 %vm190_vm0, %v3594_v6  ;;  %3502 = vmatmul.mubr.msk.f32.gmra.mxu1 %vm190_vm0, %v3595_v7 }
  0xe8   :  { %3543 = vmatprep.subr.msk.mxu0 %vm2628_vm10, %v3694_v15  ;;  %3564 = vmatprep.subr.msk.mxu1 %vm2684_vm11, %v3694_v15  ;;  %vm2677_vm10 = vcmp.eq.s32.totalorder %v3816_v18, %v4714_v19  ;;  %vm2620_vm11 = vcmp.eq.s32.totalorder %v3729_v2, %v4699_v11  ;;  %v445_v11 = vunpack.c.l.s4 %v3695_v10 }
  0xe9   :  { %3544 = vmatpush1.msk.msra.mxu0 %vm2627_vm12, %v3694_v15  ;;  %3565 = vmatpush1.msk.msra.mxu1 %vm2683_vm13, %v3694_v15  ;;  %vm2676_vm12 = vcmp.eq.s32.totalorder %v3729_v2, %v4702_v12  ;;  %vm2619_vm13 = vcmp.eq.s32.totalorder %v3729_v2, %v4711_v13 }
  0xea   :  { %3545 = vmatprep.subr.msk.mxu0 %vm2626_vm14, %v3694_v15  ;;  %3566 = vmatprep.subr.msk.mxu1 %vm2682_vm15, %v3694_v15  ;;  %vm2675_vm14 = vcmp.eq.s32.totalorder %v3729_v2, %v4714_v19 }
  0xeb   :  { %2448 = vmatprep.mubr.f32.mxu0 %v3693_v1  ;;  %2543 = vmatprep.mubr.f32.mxu1 %v3693_v1 }
  0xec   :  { %3546 = vmatpush1.msk.msra.mxu0 %vm2625_vm1, %v3694_v15  ;;  %3567 = vmatpush1.msk.msra.mxu1 %vm2681_vm2, %v3694_v15 }
  0xed   :  { %3482 = vmatmul.mubr.msk.f32.gmra.mxu0 %vm190_vm0, %v3596_v14  ;;  %3503 = vmatmul.mubr.msk.f32.gmra.mxu1 %vm190_vm0, %v3597_v16 }
  0xee   :  { %3547 = vmatprep.subr.msk.mxu0 %vm2624_vm3, %v3694_v15  ;;  %3568 = vmatprep.subr.msk.mxu1 %vm2680_vm4, %v3694_v15 }
  0xef   :  { %3548 = vmatpush1.msk.msra.mxu0 %vm2623_vm5, %v3694_v15  ;;  %3569 = vmatpush1.msk.msra.mxu1 %vm2679_vm6, %v3694_v15 }
  0xf0   :  { %2454 = vmatprep.mubr.f32.mxu0 %v3693_v1  ;;  %2549 = vmatprep.mubr.f32.mxu1 %v3693_v1 }
  0xf1   :  { %3549 = vmatprep.subr.msk.mxu0 %vm2622_vm7, %v3694_v15  ;;  %3570 = vmatprep.subr.msk.mxu1 %vm2678_vm8, %v3694_v15 }
  0xf2   :  { %3483 = vmatmul.mubr.msk.f32.gmra.mxu0 %vm190_vm0, %v3598_v17  ;;  %3504 = vmatmul.mubr.msk.f32.gmra.mxu1 %vm190_vm0, %v3599_v21 }
  0xf3   :  { %3550 = vmatpush1.msk.msra.mxu0 %vm2621_vm9, %v3694_v15  ;;  %3571 = vmatpush1.msk.msra.mxu1 %vm2677_vm10, %v3694_v15 }
  0xf4   :  { %3551 = vmatprep.subr.msk.mxu0 %vm2620_vm11, %v3694_v15  ;;  %3572 = vmatprep.subr.msk.mxu1 %vm2676_vm12, %v3694_v15 }
  0xf5   :  { %3552 = vmatpush1.msk.msra.mxu0 %vm2619_vm13, %v3694_v15  ;;  %2787 = vmatprep.mubr.f32.mxu0 %v3693_v1 }
  0xf6   :  { %3573 = vmatpush1.msk.msra.mxu1 %vm2675_vm14, %v3694_v15  ;;  %2882 = vmatprep.mubr.f32.mxu1 %v3693_v1 }
  0xf7   :  { %3553 = vmatmul.mubr.msk.f32.vlgmr.msra.gmra.mxu0 %vm190_vm0, %v4734_v3  ;;  %3574 = vmatmul.mubr.msk.f32.vlgmr.msra.gmra.mxu1 %vm190_vm0, %v4738_v4 }
  0xf8   :  { %2793 = vmatprep.mubr.f32.mxu0 %v3693_v1  ;;  %2888 = vmatprep.mubr.f32.mxu1 %v3693_v1 }
  0xfb   :  { %3554 = vmatmul.mubr.msk.f32.gmra.mxu0 %vm190_vm0, %v4762_v5  ;;  %3575 = vmatmul.mubr.msk.f32.gmra.mxu1 %vm190_vm0, %v4766_v20 }
  0xfc   :  { %2799 = vmatprep.mubr.f32.mxu0 %v3693_v1  ;;  %2894 = vmatprep.mubr.f32.mxu1 %v3693_v1 }
  0xff   :  { %3555 = vmatmul.mubr.msk.f32.gmra.mxu0 %vm190_vm0, %v3594_v6  ;;  %3576 = vmatmul.mubr.msk.f32.gmra.mxu1 %vm190_vm0, %v3595_v7  ;;  %v446_v7 = vunpack.c.0.s8 %v445_v11 }
 0x100   :  { %2805 = vmatprep.mubr.f32.mxu0 %v3693_v1  ;;  %2900 = vmatprep.mubr.f32.mxu1 %v3693_v1 }
 0x101   :  { %v272_v15 = vpop.f32.mrf.mxu0  ;;  %v382_v18 = vpop.f32.mrf.mxu1 }
 0x102   :  { %v411_v33 = vmul.f32 %v382_v18, %v272_v15  ;;  %v4877_v18 = vsub.s32 %v446_v7, %v3729_v2 }
 0x103   :  { %3556 = vmatmul.mubr.msk.f32.gmra.mxu0 %vm190_vm0, %v3596_v14  ;;  %3577 = vmatmul.mubr.msk.f32.gmra.mxu1 %vm190_vm0, %v3597_v16  ;;  %v274_v22 = vpop.f32.mrf.mxu0  ;;  %v384_v23 = vpop.f32.mrf.mxu1 }
 0x104   :  { %2811 = vmatprep.mubr.f32.mxu0 %v3693_v1  ;;  %2906 = vmatprep.mubr.f32.mxu1 %v3693_v1  ;;  %v412_v38 = vmul.f32 %v384_v23, %v274_v22 }
 0x106   :  { %v278_v24 = vpop.f32.mrf.mxu0  ;;  %v388_v25 = vpop.f32.mrf.mxu1 }
 0x107   :  { %3557 = vmatmul.mubr.msk.f32.gmra.mxu0 %vm190_vm0, %v3598_v17  ;;  %3578 = vmatmul.mubr.msk.f32.gmra.mxu1 %vm190_vm0, %v3599_v21  ;;  %v413_v32 = vmul.f32 %v388_v25, %v278_v24  ;;  %vm4881_vm0 = vcmp.lt.s32.totalorder %v66_v0, 256 }
 0x108   :  { %v280_v26 = vpop.f32.mrf.mxu0  ;;  %v390_v27 = vpop.f32.mrf.mxu1 }
 0x109   :  { %v414_v34 = vmul.f32 %v390_v27, %v280_v26  ;;  %v421_v1 = vadd.f32 %v413_v32, %v411_v33 }
 0x10b   :  { %v284_v28 = vpop.f32.mrf.mxu0  ;;  %v394_v29 = vpop.f32.mrf.mxu1  ;;  %v431_v43 = vadd.f32 %v414_v34, %v412_v38 }
 0x10c   :  { %v415_v35 = vmul.f32 %v394_v29, %v284_v28 }
 0x10d   :  { %v286_v30 = vpop.f32.mrf.mxu0  ;;  %v396_v31 = vpop.f32.mrf.mxu1 }
 0x10e   :  { %v416_v39 = vmul.f32 %v396_v31, %v286_v30  ;;  %v422_v44 = vadd.f32 %v421_v1, %v415_v35 }
 0x110   :  { %v432_v48 = vadd.f32 %v431_v43, %v416_v39 }
 0x111   :  { %v290_v36 = vpop.f32.mrf.mxu0  ;;  %v400_v37 = vpop.f32.mrf.mxu1 }
 0x112   :  { %v417_v40 = vmul.f32 %v400_v37, %v290_v36 }
 0x113   :  { %v292_v41 = vpop.f32.mrf.mxu0  ;;  %v402_v42 = vpop.f32.mrf.mxu1 }
 0x114   :  { %v418_v45 = vmul.f32 %v402_v42, %v292_v41  ;;  %v423_v49 = vadd.f32 %v422_v44, %v417_v40 }
 0x116   :  { %v296_v46 = vpop.f32.mrf.mxu0  ;;  %v406_v47 = vpop.f32.mrf.mxu1  ;;  %v433_v53 = vadd.f32 %v432_v48, %v418_v45 }
 0x117   :  { %v419_v50 = vmul.f32 %v406_v47, %v296_v46 }
 0x118   :  { %v298_v51 = vpop.f32.mrf.mxu0  ;;  %v408_v52 = vpop.f32.mrf.mxu1 }
 0x119   :  { %v424_v54 = vadd.f32 %v423_v49, %v419_v50  ;;  %v420_v55 = vmul.f32 %v408_v52, %v298_v51 }
 0x11b   :  { %v425_v56 = vrot.slane %v424_v54, 4  ;;  %v434_v57 = vadd.f32 %v433_v53, %v420_v55  ;;  %v647_v58 = vpop.f32.mrf.mxu0  ;;  %v742_v59 = vpop.f32.mrf.mxu1 }
 0x11c   :  { %v771_v27 = vmul.f32 %v742_v59, %v647_v58 }
 0x11d   :  { %v426_v60 = vadd.f32 %v425_v56, %v424_v54  ;;  %v435_v61 = vrot.slane %v434_v57, 4  ;;  %v649_v62 = vpop.f32.mrf.mxu0  ;;  %v744_v63 = vpop.f32.mrf.mxu1 }
 0x11e   :  { %v772_v33 = vmul.f32 %v744_v63, %v649_v62 }
 0x11f   :  { %v427_v8 = vrot.slane %v426_v60, 2  ;;  %v436_v9 = vadd.f32 %v435_v61, %v434_v57 }
 0x120   :  { %v653_v12 = vpop.f32.mrf.mxu0  ;;  %v748_v13 = vpop.f32.mrf.mxu1 }
 0x121   :  { %v428_v19 = vadd.f32 %v427_v8, %v426_v60  ;;  %v437_v3 = vrot.slane %v436_v9, 2  ;;  %v773_v25 = vmul.f32 %v748_v13, %v653_v12 }
 0x122   :  { %v655_v4 = vpop.f32.mrf.mxu0  ;;  %v750_v5 = vpop.f32.mrf.mxu1 }
 0x123   :  { %v429_v20 = vrot.slane %v428_v19, 1  ;;  %v438_v6 = vadd.f32 %v437_v3, %v436_v9  ;;  %v774_v28 = vmul.f32 %v750_v5, %v655_v4  ;;  %v781_v34 = vadd.f32 %v773_v25, %v771_v27 }
 0x125   :  { %v439_v14 = vrot.slane %v438_v6, 1  ;;  %v659_v16 = vpop.f32.mrf.mxu0  ;;  %v754_v17 = vpop.f32.mrf.mxu1  ;;  %v430_v21 = vadd.f32 %v429_v20, %v428_v19  ;;  %v791_v1 = vadd.f32 %v774_v28, %v772_v33 }
 0x126   :  { %v775_v29 = vmul.f32 %v754_v17, %v659_v16 }
 0x127   :  { %v440_v15 = vadd.f32 %v439_v14, %v438_v6  ;;  %v661_v22 = vpop.f32.mrf.mxu0  ;;  %v756_v23 = vpop.f32.mrf.mxu1 }
 0x128   :  { %v776_v35 = vmul.f32 %v756_v23, %v661_v22  ;;  %v782_v39 = vadd.f32 %v781_v34, %v775_v29 }
 0x129   :  { %v443_v24 = vcombine.low %v430_v21, %v440_v15 }
 0x12a   :  { %v792_v0 = vadd.f32 %v791_v1, %v776_v35 }
 0x12b   :  { %v450_v26 = vrot.slane %v443_v24, %v4877_v18  ;;  %v665_v30 = vpop.f32.mrf.mxu0  ;;  %v760_v31 = vpop.f32.mrf.mxu1 }
 0x12c   :  { %v777_v36 = vmul.f32 %v760_v31, %v665_v30 }
 0x12d   :  { %v457_v2 = vrot.slane %v450_v26, %v4877_v18  ;;  %v667_v37 = vpop.f32.mrf.mxu0  ;;  %v762_v38 = vpop.f32.mrf.mxu1 }
 0x12e   :  { %v778_v40 = vmul.f32 %v762_v38, %v667_v37  ;;  %v783_v43 = vadd.f32 %v782_v39, %v777_v36 }
 0x12f   :  { %463 = vst.msk [vmem:[#allocation8] ss:$8 sm:$0x3] %vm4881_vm0, %v457_v2 }
 0x130   :  { %v671_v41 = vpop.f32.mrf.mxu0  ;;  %v766_v42 = vpop.f32.mrf.mxu1  ;;  %v793_v47 = vadd.f32 %v792_v0, %v778_v40 }
 0x131   :  { %v779_v44 = vmul.f32 %v766_v42, %v671_v41 }
 0x132   :  { %v673_v45 = vpop.f32.mrf.mxu0  ;;  %v768_v46 = vpop.f32.mrf.mxu1 }
 0x133   :  { %v784_v48 = vadd.f32 %v783_v43, %v779_v44  ;;  %v780_v49 = vmul.f32 %v768_v46, %v673_v45 }
 0x135   :  { %v785_v50 = vrot.slane %v784_v48, 4  ;;  %v794_v51 = vadd.f32 %v793_v47, %v780_v49  ;;  %v1004_v52 = vpop.f32.mrf.mxu0  ;;  %v1099_v53 = vpop.f32.mrf.mxu1 }
 0x136   :  { %v1128_v16 = vmul.f32 %v1099_v53, %v1004_v52 }
 0x137   :  { %v786_v54 = vadd.f32 %v785_v50, %v784_v48  ;;  %v795_v55 = vrot.slane %v794_v51, 4  ;;  %v1006_v56 = vpop.f32.mrf.mxu0  ;;  %v1101_v57 = vpop.f32.mrf.mxu1 }
 0x138   :  { %v1129_v23 = vmul.f32 %v1101_v57, %v1006_v56 }
 0x139   :  { %v787_v58 = vrot.slane %v786_v54, 2  ;;  %v796_v59 = vadd.f32 %v795_v55, %v794_v51 }
 0x13a   :  { %v1010_v60 = vpop.f32.mrf.mxu0  ;;  %v1105_v61 = vpop.f32.mrf.mxu1 }
 0x13b   :  { %v788_v62 = vadd.f32 %v787_v58, %v786_v54  ;;  %v797_v63 = vrot.slane %v796_v59, 2  ;;  %v1130_v7 = vmul.f32 %v1105_v61, %v1010_v60 }
 0x13c   :  { %v1012_v8 = vpop.f32.mrf.mxu0  ;;  %v1107_v9 = vpop.f32.mrf.mxu1 }
 0x13d   :  { %v789_v10 = vrot.slane %v788_v62, 1  ;;  %v798_v11 = vadd.f32 %v797_v63, %v796_v59  ;;  %v1131_v17 = vmul.f32 %v1107_v9, %v1012_v8  ;;  %v1138_v25 = vadd.f32 %v1130_v7, %v1128_v16 }
 0x13f   :  { %v799_v12 = vrot.slane %v798_v11, 1  ;;  %v1016_v13 = vpop.f32.mrf.mxu0  ;;  %v1111_v19 = vpop.f32.mrf.mxu1  ;;  %v790_v3 = vadd.f32 %v789_v10, %v788_v62  ;;  %v1148_v30 = vadd.f32 %v1131_v17, %v1129_v23 }
 0x140   :  { %v1132_v21 = vmul.f32 %v1111_v19, %v1016_v13 }
 0x141   :  { %v800_v4 = vadd.f32 %v799_v12, %v798_v11  ;;  %v1018_v5 = vpop.f32.mrf.mxu0  ;;  %v1113_v20 = vpop.f32.mrf.mxu1 }
 0x142   :  { %v1133_v26 = vmul.f32 %v1113_v20, %v1018_v5  ;;  %v1139_v31 = vadd.f32 %v1138_v25, %v1132_v21 }
 0x143   :  { %v803_v6 = vcombine.low %v790_v3, %v800_v4 }
 0x144   :  { %v1149_v35 = vadd.f32 %v1148_v30, %v1133_v26 }
 0x145   :  { %v810_v14 = vrot.slane %v803_v6, %v4877_v18  ;;  %v1022_v15 = vpop.f32.mrf.mxu0  ;;  %v1117_v22 = vpop.f32.mrf.mxu1 }
 0x146   :  { %v1134_v27 = vmul.f32 %v1117_v22, %v1022_v15 }
 0x147   :  { %v817_v24 = vrot.slane %v810_v14, %v4877_v18  ;;  %v1024_v28 = vpop.f32.mrf.mxu0  ;;  %v1119_v29 = vpop.f32.mrf.mxu1 }
 0x148   :  { %v1135_v33 = vmul.f32 %v1119_v29, %v1024_v28  ;;  %v1140_v36 = vadd.f32 %v1139_v31, %v1134_v27 }
 0x149   :  { %820 = vst.msk [vmem:[#allocation8 + $0x1] ss:$8 sm:$0x3] %vm4881_vm0, %v817_v24 }
 0x14a   :  { %v1028_v2 = vpop.f32.mrf.mxu0  ;;  %v1123_v34 = vpop.f32.mrf.mxu1  ;;  %v1150_v39 = vadd.f32 %v1149_v35, %v1135_v33 }
 0x14b   :  { %v1136_v37 = vmul.f32 %v1123_v34, %v1028_v2 }
 0x14c   :  { %v1030_v38 = vpop.f32.mrf.mxu0  ;;  %v1125_v1 = vpop.f32.mrf.mxu1 }
 0x14d   :  { %v1141_v40 = vadd.f32 %v1140_v36, %v1136_v37  ;;  %v1137_v41 = vmul.f32 %v1125_v1, %v1030_v38 }
 0x14f   :  { %v1142_v42 = vrot.slane %v1141_v40, 4  ;;  %v1151_v0 = vadd.f32 %v1150_v39, %v1137_v41  ;;  %v1361_v43 = vpop.f32.mrf.mxu0  ;;  %v1456_v44 = vpop.f32.mrf.mxu1 }
 0x150   :  { %v1485_v13 = vmul.f32 %v1456_v44, %v1361_v43 }
 0x151   :  { %v1143_v45 = vadd.f32 %v1142_v42, %v1141_v40  ;;  %v1152_v46 = vrot.slane %v1151_v0, 4  ;;  %v1363_v47 = vpop.f32.mrf.mxu0  ;;  %v1458_v48 = vpop.f32.mrf.mxu1 }
 0x152   :  { %v1486_v20 = vmul.f32 %v1458_v48, %v1363_v47 }
 0x153   :  { %v1144_v49 = vrot.slane %v1143_v45, 2  ;;  %v1153_v50 = vadd.f32 %v1152_v46, %v1151_v0 }
 0x154   :  { %v1367_v51 = vpop.f32.mrf.mxu0  ;;  %v1462_v52 = vpop.f32.mrf.mxu1 }
 0x155   :  { %v1145_v53 = vadd.f32 %v1144_v49, %v1143_v45  ;;  %v1154_v54 = vrot.slane %v1153_v50, 2  ;;  %v1487_v11 = vmul.f32 %v1462_v52, %v1367_v51 }
 0x156   :  { %v1369_v55 = vpop.f32.mrf.mxu0  ;;  %v1464_v56 = vpop.f32.mrf.mxu1 }
 0x157   :  { %v1146_v57 = vrot.slane %v1145_v53, 1  ;;  %v1155_v58 = vadd.f32 %v1154_v54, %v1153_v50  ;;  %v1488_v19 = vmul.f32 %v1464_v56, %v1369_v55  ;;  %v1495_v7 = vadd.f32 %v1487_v11, %v1485_v13 }
 0x159   :  { %v1156_v59 = vrot.slane %v1155_v58, 1  ;;  %v1373_v60 = vpop.f32.mrf.mxu0  ;;  %v1468_v61 = vpop.f32.mrf.mxu1  ;;  %v1147_v62 = vadd.f32 %v1146_v57, %v1145_v53  ;;  %v1505_v15 = vadd.f32 %v1488_v19, %v1486_v20 }
 0x15a   :  { %v1489_v3 = vmul.f32 %v1468_v61, %v1373_v60 }
 0x15b   :  { %v1157_v63 = vadd.f32 %v1156_v59, %v1155_v58  ;;  %v1375_v8 = vpop.f32.mrf.mxu0  ;;  %v1470_v9 = vpop.f32.mrf.mxu1 }
 0x15c   :  { %v1490_v14 = vmul.f32 %v1470_v9, %v1375_v8  ;;  %v1496_v22 = vadd.f32 %v1495_v7, %v1489_v3 }
 0x15d   :  { %v1160_v10 = vcombine.low %v1147_v62, %v1157_v63 }
 0x15e   :  { %v1506_v26 = vadd.f32 %v1505_v15, %v1490_v14 }
 0x15f   :  { %v1167_v12 = vrot.slane %v1160_v10, %v4877_v18  ;;  %v1379_v4 = vpop.f32.mrf.mxu0  ;;  %v1474_v5 = vpop.f32.mrf.mxu1 }
 0x160   :  { %v1491_v16 = vmul.f32 %v1474_v5, %v1379_v4 }
 0x161   :  { %v1174_v6 = vrot.slane %v1167_v12, %v4877_v18  ;;  %v1381_v17 = vpop.f32.mrf.mxu0  ;;  %v1476_v21 = vpop.f32.mrf.mxu1 }
 0x162   :  { %v1492_v23 = vmul.f32 %v1476_v21, %v1381_v17  ;;  %v1497_v27 = vadd.f32 %v1496_v22, %v1491_v16 }
 0x163   :  { %1177 = vst.msk [vmem:[#allocation8 + $0x2] ss:$8 sm:$0x3] %vm4881_vm0, %v1174_v6 }
 0x164   :  { %v1385_v24 = vpop.f32.mrf.mxu0  ;;  %v1480_v25 = vpop.f32.mrf.mxu1  ;;  %v1507_v31 = vadd.f32 %v1506_v26, %v1492_v23 }
 0x165   :  { %v1493_v28 = vmul.f32 %v1480_v25, %v1385_v24 }
 0x166   :  { %v1387_v29 = vpop.f32.mrf.mxu0  ;;  %v1482_v30 = vpop.f32.mrf.mxu1 }
 0x167   :  { %v1498_v33 = vadd.f32 %v1497_v27, %v1493_v28  ;;  %v1494_v2 = vmul.f32 %v1482_v30, %v1387_v29 }
 0x169   :  { %v1499_v34 = vrot.slane %v1498_v33, 4  ;;  %v1508_v35 = vadd.f32 %v1507_v31, %v1494_v2  ;;  %v1718_v36 = vpop.f32.mrf.mxu0  ;;  %v1813_v37 = vpop.f32.mrf.mxu1 }
 0x16a   :  { %v1842_v60 = vmul.f32 %v1813_v37, %v1718_v36 }
 0x16b   :  { %v1500_v38 = vadd.f32 %v1499_v34, %v1498_v33  ;;  %v1509_v1 = vrot.slane %v1508_v35, 4  ;;  %v1720_v39 = vpop.f32.mrf.mxu0  ;;  %v1815_v40 = vpop.f32.mrf.mxu1 }
 0x16c   :  { %v1843_v9 = vmul.f32 %v1815_v40, %v1720_v39 }
 0x16d   :  { %v1501_v41 = vrot.slane %v1500_v38, 2  ;;  %v1510_v42 = vadd.f32 %v1509_v1, %v1508_v35 }
 0x16e   :  { %v1724_v0 = vpop.f32.mrf.mxu0  ;;  %v1819_v43 = vpop.f32.mrf.mxu1 }
 0x16f   :  { %v1502_v44 = vadd.f32 %v1501_v41, %v1500_v38  ;;  %v1511_v45 = vrot.slane %v1510_v42, 2  ;;  %v1844_v58 = vmul.f32 %v1819_v43, %v1724_v0 }
 0x170   :  { %v1726_v46 = vpop.f32.mrf.mxu0  ;;  %v1821_v47 = vpop.f32.mrf.mxu1 }
 0x171   :  { %v1503_v48 = vrot.slane %v1502_v44, 1  ;;  %v1512_v49 = vadd.f32 %v1511_v45, %v1510_v42  ;;  %v1845_v61 = vmul.f32 %v1821_v47, %v1726_v46  ;;  %v1852_v11 = vadd.f32 %v1844_v58, %v1842_v60 }
 0x173   :  { %v1513_v50 = vrot.slane %v1512_v49, 1  ;;  %v1730_v51 = vpop.f32.mrf.mxu0  ;;  %v1825_v52 = vpop.f32.mrf.mxu1  ;;  %v1504_v53 = vadd.f32 %v1503_v48, %v1502_v44  ;;  %v1862_v4 = vadd.f32 %v1845_v61, %v1843_v9 }
 0x174   :  { %v1846_v62 = vmul.f32 %v1825_v52, %v1730_v51 }
 0x175   :  { %v1514_v54 = vadd.f32 %v1513_v50, %v1512_v49  ;;  %v1732_v55 = vpop.f32.mrf.mxu0  ;;  %v1827_v56 = vpop.f32.mrf.mxu1 }
 0x176   :  { %v1847_v12 = vmul.f32 %v1827_v56, %v1732_v55  ;;  %v1853_v5 = vadd.f32 %v1852_v11, %v1846_v62 }
 0x177   :  { %v1517_v57 = vcombine.low %v1504_v53, %v1514_v54 }
 0x178   :  { %v1863_v14 = vadd.f32 %v1862_v4, %v1847_v12 }
 0x179   :  { %v1524_v59 = vrot.slane %v1517_v57, %v4877_v18  ;;  %v1736_v63 = vpop.f32.mrf.mxu0  ;;  %v1831_v8 = vpop.f32.mrf.mxu1 }
 0x17a   :  { %v1848_v13 = vmul.f32 %v1831_v8, %v1736_v63 }
 0x17b   :  { %v1531_v10 = vrot.slane %v1524_v59, %v4877_v18  ;;  %v1738_v19 = vpop.f32.mrf.mxu0  ;;  %v1833_v3 = vpop.f32.mrf.mxu1 }
 0x17c   :  { %v1849_v20 = vmul.f32 %v1833_v3, %v1738_v19  ;;  %v1854_v16 = vadd.f32 %v1853_v5, %v1848_v13 }
 0x17d   :  { %1534 = vst.msk [vmem:[#allocation8 + $0x3] ss:$8 sm:$0x3] %vm4881_vm0, %v1531_v10 }
 0x17e   :  { %v1742_v6 = vpop.f32.mrf.mxu0  ;;  %v1837_v7 = vpop.f32.mrf.mxu1  ;;  %v1864_v22 = vadd.f32 %v1863_v14, %v1849_v20 }
 0x17f   :  { %v1850_v17 = vmul.f32 %v1837_v7, %v1742_v6 }
 0x180   :  { %v1744_v21 = vpop.f32.mrf.mxu0  ;;  %v1839_v15 = vpop.f32.mrf.mxu1 }
 0x181   :  { %v1855_v23 = vadd.f32 %v1854_v16, %v1850_v17  ;;  %v1851_v24 = vmul.f32 %v1839_v15, %v1744_v21 }
 0x183   :  { %v1856_v25 = vrot.slane %v1855_v23, 4  ;;  %v1865_v26 = vadd.f32 %v1864_v22, %v1851_v24  ;;  %v2075_v27 = vpop.f32.mrf.mxu0  ;;  %v2170_v28 = vpop.f32.mrf.mxu1 }
 0x184   :  { %v2199_v51 = vmul.f32 %v2170_v28, %v2075_v27 }
 0x185   :  { %v1857_v29 = vadd.f32 %v1856_v25, %v1855_v23  ;;  %v1866_v30 = vrot.slane %v1865_v26, 4  ;;  %v2077_v31 = vpop.f32.mrf.mxu0  ;;  %v2172_v33 = vpop.f32.mrf.mxu1 }
 0x186   :  { %v2200_v56 = vmul.f32 %v2172_v33, %v2077_v31 }
 0x187   :  { %v1858_v2 = vrot.slane %v1857_v29, 2  ;;  %v1867_v34 = vadd.f32 %v1866_v30, %v1865_v26 }
 0x188   :  { %v2081_v35 = vpop.f32.mrf.mxu0  ;;  %v2176_v36 = vpop.f32.mrf.mxu1 }
 0x189   :  { %v1859_v37 = vadd.f32 %v1858_v2, %v1857_v29  ;;  %v1868_v38 = vrot.slane %v1867_v34, 2  ;;  %v2201_v49 = vmul.f32 %v2176_v36, %v2081_v35 }
 0x18a   :  { %v2083_v1 = vpop.f32.mrf.mxu0  ;;  %v2178_v39 = vpop.f32.mrf.mxu1 }
 0x18b   :  { %v1860_v40 = vrot.slane %v1859_v37, 1  ;;  %v1869_v41 = vadd.f32 %v1868_v38, %v1867_v34  ;;  %v2202_v52 = vmul.f32 %v2178_v39, %v2083_v1  ;;  %v2209_v58 = vadd.f32 %v2201_v49, %v2199_v51 }
 0x18d   :  { %v1870_v42 = vrot.slane %v1869_v41, 1  ;;  %v2087_v0 = vpop.f32.mrf.mxu0  ;;  %v2182_v43 = vpop.f32.mrf.mxu1  ;;  %v1861_v44 = vadd.f32 %v1860_v40, %v1859_v37  ;;  %v2219_v63 = vadd.f32 %v2202_v52, %v2200_v56 }
 0x18e   :  { %v2203_v53 = vmul.f32 %v2182_v43, %v2087_v0 }
 0x18f   :  { %v1871_v45 = vadd.f32 %v1870_v42, %v1869_v41  ;;  %v2089_v46 = vpop.f32.mrf.mxu0  ;;  %v2184_v47 = vpop.f32.mrf.mxu1 }
 0x190   :  { %v2204_v59 = vmul.f32 %v2184_v47, %v2089_v46  ;;  %v2210_v8 = vadd.f32 %v2209_v58, %v2203_v53 }
 0x191   :  { %v1874_v48 = vcombine.low %v1861_v44, %v1871_v45 }
 0x192   :  { %v2220_v12 = vadd.f32 %v2219_v63, %v2204_v59 }
 0x193   :  { %v1881_v50 = vrot.slane %v1874_v48, %v4877_v18  ;;  %v2093_v54 = vpop.f32.mrf.mxu0  ;;  %v2188_v55 = vpop.f32.mrf.mxu1 }
 0x194   :  { %v2205_v60 = vmul.f32 %v2188_v55, %v2093_v54 }
 0x195   :  { %v1888_v57 = vrot.slane %v1881_v50, %v4877_v18  ;;  %v2095_v61 = vpop.f32.mrf.mxu0  ;;  %v2190_v62 = vpop.f32.mrf.mxu1 }
 0x196   :  { %v2206_v9 = vmul.f32 %v2190_v62, %v2095_v61  ;;  %v2211_v13 = vadd.f32 %v2210_v8, %v2205_v60 }
 0x197   :  { %1891 = vst.msk [vmem:[#allocation8 + $0x4] ss:$8 sm:$0x3] %vm4881_vm0, %v1888_v57 }
 0x198   :  { %v2099_v10 = vpop.f32.mrf.mxu0  ;;  %v2194_v11 = vpop.f32.mrf.mxu1  ;;  %v2221_v5 = vadd.f32 %v2220_v12, %v2206_v9 }
 0x199   :  { %v2207_v19 = vmul.f32 %v2194_v11, %v2099_v10 }
 0x19a   :  { %v2101_v3 = vpop.f32.mrf.mxu0  ;;  %v2196_v4 = vpop.f32.mrf.mxu1 }
 0x19b   :  { %v2212_v20 = vadd.f32 %v2211_v13, %v2207_v19  ;;  %v2208_v6 = vmul.f32 %v2196_v4, %v2101_v3 }
 0x19d   :  { %v2213_v7 = vrot.slane %v2212_v20, 4  ;;  %v2222_v14 = vadd.f32 %v2221_v5, %v2208_v6  ;;  %v2432_v16 = vpop.f32.mrf.mxu0  ;;  %v2527_v17 = vpop.f32.mrf.mxu1 }
 0x19e   :  { %v2556_v0 = vmul.f32 %v2527_v17, %v2432_v16 }
 0x19f   :  { %v2214_v21 = vadd.f32 %v2213_v7, %v2212_v20  ;;  %v2223_v15 = vrot.slane %v2222_v14, 4  ;;  %v2434_v22 = vpop.f32.mrf.mxu0  ;;  %v2529_v23 = vpop.f32.mrf.mxu1 }
 0x1a0   :  { %v2557_v47 = vmul.f32 %v2529_v23, %v2434_v22 }
 0x1a1   :  { %v2215_v24 = vrot.slane %v2214_v21, 2  ;;  %v2224_v25 = vadd.f32 %v2223_v15, %v2222_v14 }
 0x1a2   :  { %v2438_v26 = vpop.f32.mrf.mxu0  ;;  %v2533_v27 = vpop.f32.mrf.mxu1 }
 0x1a3   :  { %v2216_v28 = vadd.f32 %v2215_v24, %v2214_v21  ;;  %v2225_v29 = vrot.slane %v2224_v25, 2  ;;  %v2558_v41 = vmul.f32 %v2533_v27, %v2438_v26 }
 0x1a4   :  { %v2440_v30 = vpop.f32.mrf.mxu0  ;;  %v2535_v31 = vpop.f32.mrf.mxu1 }
 0x1a5   :  { %v2217_v33 = vrot.slane %v2216_v28, 1  ;;  %v2226_v2 = vadd.f32 %v2225_v29, %v2224_v25  ;;  %v2559_v43 = vmul.f32 %v2535_v31, %v2440_v30  ;;  %v2566_v49 = vadd.f32 %v2558_v41, %v2556_v0 }
 0x1a7   :  { %v2227_v34 = vrot.slane %v2226_v2, 1  ;;  %v2444_v35 = vpop.f32.mrf.mxu0  ;;  %v2539_v36 = vpop.f32.mrf.mxu1  ;;  %v2218_v37 = vadd.f32 %v2217_v33, %v2216_v28  ;;  %v2576_v54 = vadd.f32 %v2559_v43, %v2557_v47 }
 0x1a8   :  { %v2560_v44 = vmul.f32 %v2539_v36, %v2444_v35 }
 0x1a9   :  { %v2228_v38 = vadd.f32 %v2227_v34, %v2226_v2  ;;  %v2446_v1 = vpop.f32.mrf.mxu0  ;;  %v2541_v39 = vpop.f32.mrf.mxu1 }
 0x1aa   :  { %v2561_v50 = vmul.f32 %v2541_v39, %v2446_v1  ;;  %v2567_v55 = vadd.f32 %v2566_v49, %v2560_v44 }
 0x1ab   :  { %v2231_v40 = vcombine.low %v2218_v37, %v2228_v38 }
 0x1ac   :  { %v2577_v59 = vadd.f32 %v2576_v54, %v2561_v50 }
 0x1ad   :  { %v2238_v42 = vrot.slane %v2231_v40, %v4877_v18  ;;  %v2450_v45 = vpop.f32.mrf.mxu0  ;;  %v2545_v46 = vpop.f32.mrf.mxu1 }
 0x1ae   :  { %v2562_v51 = vmul.f32 %v2545_v46, %v2450_v45 }
 0x1af   :  { %v2245_v48 = vrot.slane %v2238_v42, %v4877_v18  ;;  %v2452_v52 = vpop.f32.mrf.mxu0  ;;  %v2547_v53 = vpop.f32.mrf.mxu1 }
 0x1b0   :  { %v2563_v56 = vmul.f32 %v2547_v53, %v2452_v52  ;;  %v2568_v60 = vadd.f32 %v2567_v55, %v2562_v51 }
 0x1b1   :  { %2248 = vst.msk [vmem:[#allocation8 + $0x5] ss:$8 sm:$0x3] %vm4881_vm0, %v2245_v48 }
 0x1b2   :  { %v2456_v57 = vpop.f32.mrf.mxu0  ;;  %v2551_v58 = vpop.f32.mrf.mxu1  ;;  %v2578_v8 = vadd.f32 %v2577_v59, %v2563_v56 }
 0x1b3   :  { %v2564_v61 = vmul.f32 %v2551_v58, %v2456_v57 }
 0x1b4   :  { %v2458_v62 = vpop.f32.mrf.mxu0  ;;  %v2553_v63 = vpop.f32.mrf.mxu1 }
 0x1b5   :  { %v2569_v9 = vadd.f32 %v2568_v60, %v2564_v61  ;;  %v2565_v10 = vmul.f32 %v2553_v63, %v2458_v62 }
 0x1b7   :  { %v2570_v11 = vrot.slane %v2569_v9, 4  ;;  %v2579_v12 = vadd.f32 %v2578_v8, %v2565_v10  ;;  %v2789_v13 = vpop.f32.mrf.mxu0  ;;  %v2884_v19 = vpop.f32.mrf.mxu1 }
 0x1b8   :  { %v2913_v31 = vmul.f32 %v2884_v19, %v2789_v13 }
 0x1b9   :  { %v2571_v3 = vadd.f32 %v2570_v11, %v2569_v9  ;;  %v2580_v4 = vrot.slane %v2579_v12, 4  ;;  %v2791_v5 = vpop.f32.mrf.mxu0  ;;  %v2886_v20 = vpop.f32.mrf.mxu1 }
 0x1ba   :  { %v2914_v38 = vmul.f32 %v2886_v20, %v2791_v5 }
 0x1bb   :  { %v2572_v6 = vrot.slane %v2571_v3, 2  ;;  %v2581_v7 = vadd.f32 %v2580_v4, %v2579_v12  ;;  %v2795_v14 = vpop.f32.mrf.mxu0  ;;  %v2890_v16 = vpop.f32.mrf.mxu1 }
 0x1bc   :  { %v2915_v27 = vmul.f32 %v2890_v16, %v2795_v14 }
 0x1bd   :  { %v2573_v17 = vadd.f32 %v2572_v6, %v2571_v3  ;;  %v2582_v21 = vrot.slane %v2581_v7, 2  ;;  %v2797_v15 = vpop.f32.mrf.mxu0  ;;  %v2892_v22 = vpop.f32.mrf.mxu1 }
 0x1be   :  { %v2916_v33 = vmul.f32 %v2892_v22, %v2797_v15  ;;  %v2923_v1 = vadd.f32 %v2915_v27, %v2913_v31 }
 0x1bf   :  { %v2574_v23 = vrot.slane %v2573_v17, 1  ;;  %v2583_v24 = vadd.f32 %v2582_v21, %v2581_v7  ;;  %v2801_v25 = vpop.f32.mrf.mxu0  ;;  %v2896_v26 = vpop.f32.mrf.mxu1 }
 0x1c0   :  { %v2917_v2 = vmul.f32 %v2896_v26, %v2801_v25  ;;  %v2933_v43 = vadd.f32 %v2916_v33, %v2914_v38 }
 0x1c1   :  { %v2584_v28 = vrot.slane %v2583_v24, 1  ;;  %v2803_v29 = vpop.f32.mrf.mxu0  ;;  %v2898_v30 = vpop.f32.mrf.mxu1  ;;  %v2575_v34 = vadd.f32 %v2574_v23, %v2573_v17 }
 0x1c2   :  { %v2918_v39 = vmul.f32 %v2898_v30, %v2803_v29  ;;  %v2924_v44 = vadd.f32 %v2923_v1, %v2917_v2 }
 0x1c3   :  { %v2585_v35 = vadd.f32 %v2584_v28, %v2583_v24  ;;  %v2807_v36 = vpop.f32.mrf.mxu0  ;;  %v2902_v37 = vpop.f32.mrf.mxu1 }
 0x1c4   :  { %v2919_v40 = vmul.f32 %v2902_v37, %v2807_v36  ;;  %v2934_v49 = vadd.f32 %v2933_v43, %v2918_v39 }
 0x1c5   :  { %v2588_v41 = vcombine.low %v2575_v34, %v2585_v35  ;;  %v2809_v42 = vpop.f32.mrf.mxu0  ;;  %v2904_v0 = vpop.f32.mrf.mxu1 }
 0x1c6   :  { %v2920_v45 = vmul.f32 %v2904_v0, %v2809_v42  ;;  %v2925_v50 = vadd.f32 %v2924_v44, %v2919_v40 }
 0x1c7   :  { %v2595_v46 = vrot.slane %v2588_v41, %v4877_v18  ;;  %v2813_v47 = vpop.f32.mrf.mxu0  ;;  %v2908_v48 = vpop.f32.mrf.mxu1 }
 0x1c8   :  { %v2921_v51 = vmul.f32 %v2908_v48, %v2813_v47  ;;  %v2935_v55 = vadd.f32 %v2934_v49, %v2920_v45 }
 0x1c9   :  { %v2602_v52 = vrot.slane %v2595_v46, %v4877_v18  ;;  %v2815_v53 = vpop.f32.mrf.mxu0  ;;  %v2910_v54 = vpop.f32.mrf.mxu1 }
 0x1ca   :  { %v2926_v56 = vadd.f32 %v2925_v50, %v2921_v51  ;;  %v2922_v57 = vmul.f32 %v2910_v54, %v2815_v53 }
 0x1cb   :  { %2605 = vst.msk [vmem:[#allocation8 + $0x6] ss:$8 sm:$0x3] %vm4881_vm0, %v2602_v52 }
 0x1cc   :  { %v2927_v58 = vrot.slane %v2926_v56, 4  ;;  %v2936_v59 = vadd.f32 %v2935_v55, %v2922_v57 }
 0x1ce   :  { %v2928_v60 = vadd.f32 %v2927_v58, %v2926_v56  ;;  %v2937_v61 = vrot.slane %v2936_v59, 4 }
 0x1d0   :  { %v2929_v62 = vrot.slane %v2928_v60, 2  ;;  %v2938_v63 = vadd.f32 %v2937_v61, %v2936_v59 }
 0x1d2   :  { %v2930_v8 = vadd.f32 %v2929_v62, %v2928_v60  ;;  %v2939_v9 = vrot.slane %v2938_v63, 2 }
 0x1d4   :  { %v2931_v10 = vrot.slane %v2930_v8, 1  ;;  %v2940_v11 = vadd.f32 %v2939_v9, %v2938_v63 }
 0x1d6   :  { %v2941_v12 = vrot.slane %v2940_v11, 1  ;;  %v2932_v13 = vadd.f32 %v2931_v10, %v2930_v8 }
 0x1d8   :  { %v2942_v19 = vadd.f32 %v2941_v12, %v2940_v11 }
 0x1da   :  { %v2945_v3 = vcombine.low %v2932_v13, %v2942_v19 }
 0x1dc   :  { %v2952_v4 = vrot.slane %v2945_v3, %v4877_v18 }
 0x1de   :  { %v2959_v5 = vrot.slane %v2952_v4, %v4877_v18 }
 0x1e0   :  { %2962 = vst.msk [vmem:[#allocation8 + $0x7] ss:$8 sm:$0x3] %vm4881_vm0, %v2959_v5 }
 0x1e1   :  { %3671 = shalt.err (!%p3668_p5)
}
 0x1e2   :  { %2973 = dma.vmem_to_hbm [thread:$0]  %s2971_s2, 256, %s4922_s3, [#allocation4]  }
 0x1e3   :  { %3684 = dma.done.wait [#allocation4], 256  }
 0x1e4   :  { %3685 = vsyncadd [#allocation4], 4294967040 }
 0x1e5   :  { %2977 = vsyncpa [#allocation3], 1 }
 0x1e6   :  { %2978 = vsyncpa [#allocation6], 1 }
 0x1e7   :  { %2979 = vsyncpa [#allocation4], 1 }

</bundles_post_ra>
